<compile_context>
chip_gen: v6e
topology: v6e:2x2x1
jax: 0.10.0
libtpu: 0.0.40
codegen_flags: <defaults>
</compile_context>

<pallas_src>
import functools
import math

import jax
import jax.numpy as jnp
from jax.experimental import pallas as pl
from jax.experimental.pallas import tpu as pltpu

BN_EPS = 1e-5
VMEM_LIMIT = 48 * 1024 * 1024
NEG_BIG = -3.0e38  # ~ -inf, representable in bf16

TM_TARGET = 512
TN_TARGET = 512
TK_TARGET = 512
FULL_K_MAX = 1536   # use a single full-K block up to this size


# ----------------------------------------------------------------------------
# small helpers
# ----------------------------------------------------------------------------
def _round_up(v, m):
    return (v + m - 1) // m * m


def _pad2(x, rows, cols):
    r, c = x.shape
    if (r, c) == (rows, cols):
        return x
    return jnp.pad(x, ((0, rows - r), (0, cols - c)))


def _largest_divisor(n, target, align):
    """Largest d <= target with d % align == 0 and d | n (or None)."""
    for cand in range(min(target, n), align - 1, -1):
        if cand % align == 0 and n % cand == 0:
            return cand
    return None


def _pick_tile_m(M, target=TM_TARGET):
    """(tm, Mp): prefer full M or a 16-aligned divisor (bf16 sublane packing)."""
    if M <= target:
        return M, M
    t = _largest_divisor(M, target, 16) or _largest_divisor(M, target, 8)
    if t is not None:
        return t, M
    return target, _round_up(M, target)          # rare fallback (pads)


def _pick_tile_n(N, target=TN_TARGET):
    """(tn, Np): lane-dense (multiple of 128) divisor, else full N (no pad)."""
    t = _largest_divisor(N, target, 128)
    if t is not None:
        return t, N
    if N <= target:
        return N, N
    Np = _round_up(N, 128)
    return (_largest_divisor(Np, target, 128) or 128), Np


def _pick_tile_k(K, target=TK_TARGET, full_max=FULL_K_MAX):
    """(tk, Kp): single full-K block when small, else 128-aligned divisor."""
    if K <= full_max:
        return K, K
    t = _largest_divisor(K, target, 128)
    if t is not None:
        return t, K
    Kp = _round_up(K, 128)
    return (_largest_divisor(Kp, target, 128) or 128), Kp


def _pick_rows(ho, taps):
    """Rows of output handled per grid step for the max-pool kernel."""
    limit = max(1, min(8, 64 // max(taps, 1)))
    th = 1
    for d in range(1, limit + 1):
        if ho % d == 0:
            th = d
    return th


# ----------------------------------------------------------------------------
# Pallas kernels
# ----------------------------------------------------------------------------
def _mm_bn_kernel(*refs, relu, has_res, has_blend):
    """Tiled out = blend?(relu?((A @ W_bnfolded) + bias (+ residual))).

    Grid = (M tiles, N tiles, K tiles); f32 accumulator scratch; epilogue in
    f32 on the last K step only.  Blend: out = p_exec*main + p_skip*residual,
    with per-row probability columns (tm, 1).
    """
    a_ref, w_ref, b_ref = refs[0], refs[1], refs[2]
    pos = 3
    r_ref = pe_ref = ps_ref = None
    if has_res:
        r_ref = refs[pos]
        pos += 1
    if has_blend:
        pe_ref, ps_ref = refs[pos], refs[pos + 1]
        pos += 2
    o_ref, acc_ref = refs[pos], refs[pos + 1]

    @pl.when(pl.program_id(2) == 0)
    def _init():
        acc_ref[...] = jnp.zeros_like(acc_ref)

    acc_ref[...] += jnp.dot(a_ref[...], w_ref[...],
                            preferred_element_type=jnp.float32)

    @pl.when(pl.program_id(2) == pl.num_programs(2) - 1)
    def _finalize():
        out = acc_ref[...] + b_ref[...]
        if has_res:
            res = r_ref[...].astype(jnp.float32)
            out = out + res
        if relu:
            out = jnp.maximum(out, 0.0)
        if has_blend:
            out = pe_ref[...] * out + ps_ref[...] * res
        o_ref[...] = out.astype(o_ref.dtype)


def _maxpool_tap_kernel(x_ref, o_ref, *, kh, kw, stride, th):
    """3x3/s2 max-pool from column-tap slabs."""
    y0 = pl.program_id(1) * th
    for r in range(th):
        best = None
        for dy in range(kh):
            qy, ry = dy // stride, dy % stride
            row = y0 + r + qy
            for dx in range(kw):
                v = x_ref[ry * kw + dx, row]                    # (Wo, C)
                best = v if best is None else jnp.maximum(best, v)
        o_ref[0, r] = best.astype(o_ref.dtype)


def _gap_kernel(x_ref, o_ref):
    """[1, HW, C] -> [1, C] spatial mean (f32)."""
    o_ref[...] = jnp.mean(x_ref[...].astype(jnp.float32), axis=1)


def _gate_mlp_kernel(x_ref, w1_ref, b1_ref, w2_ref, b2_ref, o_ref):
    """Fused routing gate: GAP -> fc1 -> relu -> fc2 -> softmax, one batch row."""
    pooled = jnp.mean(x_ref[...].astype(jnp.float32), axis=1)          # (1, C)
    h = jnp.dot(pooled, w1_ref[...], preferred_element_type=jnp.float32)
    h = jnp.maximum(h + b1_ref[...], 0.0)
    logits = jnp.dot(h, w2_ref[...], preferred_element_type=jnp.float32)
    logits = logits + b2_ref[...]
    m = jnp.max(logits, axis=-1, keepdims=True)
    e = jnp.exp(logits - m)
    o_ref[...] = e / jnp.sum(e, axis=-1, keepdims=True)


# ----------------------------------------------------------------------------
# Pallas wrappers
# ----------------------------------------------------------------------------
def matmul_bn(a, w, bias, residual=None, probs=None, relu=False,
              out_dtype=jnp.bfloat16):
    """Tiled bf16 matmul, fused bias/residual/ReLU/routing-blend epilogue."""
    M, K = a.shape
    _, N = w.shape
    tm, Mp = _pick_tile_m(M)
    tn, Np = _pick_tile_n(N)
    tk, Kp = _pick_tile_k(K)

    a_p = a.astype(jnp.bfloat16)
    if (Mp, Kp) != (M, K):
        a_p = _pad2(a_p, Mp, Kp)
    w_p = w.astype(jnp.bfloat16)
    if (Kp, Np) != (K, N):
        w_p = _pad2(w_p, Kp, Np)
    b_p = bias.reshape(1, N).astype(jnp.float32)
    if Np != N:
        b_p = _pad2(b_p, 1, Np)

    args = [a_p, w_p, b_p]
    in_specs = [
        pl.BlockSpec((tm, tk), lambda i, j, k: (i, k)),
        pl.BlockSpec((tk, tn), lambda i, j, k: (k, j)),
        pl.BlockSpec((1, tn), lambda i, j, k: (0, j)),
    ]
    has_res = residual is not None
    if has_res:
        r_p = residual.astype(jnp.bfloat16)
        if (Mp, Np) != (M, N):
            r_p = _pad2(r_p, Mp, Np)
        args.append(r_p)
        in_specs.append(pl.BlockSpec((tm, tn), lambda i, j, k: (i, j)))
    has_blend = probs is not None
    if has_blend:
        assert has_res, "routing blend requires a residual (skip) operand"
        pe, ps = probs                                # each (M, 1) f32
        if Mp != M:
            pe, ps = _pad2(pe, Mp, 1), _pad2(ps, Mp, 1)
        args += [pe, ps]
        in_specs += [pl.BlockSpec((tm, 1), lambda i, j, k: (i, 0)),
                     pl.BlockSpec((tm, 1), lambda i, j, k: (i, 0))]

    kernel = functools.partial(_mm_bn_kernel, relu=relu,
                               has_res=has_res, has_blend=has_blend)
    out = pl.pallas_call(
        kernel,
        out_shape=jax.ShapeDtypeStruct((Mp, Np), out_dtype),
        grid=(Mp // tm, Np // tn, Kp // tk),
        in_specs=in_specs,
        out_specs=pl.BlockSpec((tm, tn), lambda i, j, k: (i, j)),
        scratch_shapes=[pltpu.VMEM((tm, tn), jnp.float32)],
        compiler_params=pltpu.CompilerParams(
            dimension_semantics=("parallel", "parallel", "arbitrary"),
            vmem_limit_bytes=VMEM_LIMIT),
    )(*args)
    if (Mp, Np) != (M, N):
        out = out[:M, :N]
    return out


def _im2col(x, kh, kw, stride, padding):
    """NHWC -> (B*Ho*Wo, kh*kw*C) patches, (dy, dx, c) channel order."""
    B, H, W, C = x.shape
    Ho = (H + 2 * padding - kh) // stride + 1
    Wo = (W + 2 * padding - kw) // stride + 1
    xp = jnp.pad(x, ((0, 0), (padding, padding), (padding, padding), (0, 0)))
    cols = []
    for dy in range(kh):
        for dx in range(kw):
            cols.append(xp[:, dy: dy + stride * (Ho - 1) + 1: stride,
                           dx: dx + stride * (Wo - 1) + 1: stride, :])
    patches = jnp.concatenate(cols, axis=-1)          # (B, Ho, Wo, kh*kw*C)
    return patches.reshape(B * Ho * Wo, kh * kw * C), Ho, Wo


def conv_kxk_bn(x, w_mat, bias, *, kh, kw, stride, padding, relu=True):
    """kxk conv + folded BN (+ReLU) via im2col routed through the MXU matmul."""
    B = x.shape[0]
    a, Ho, Wo = _im2col(x.astype(jnp.bfloat16), kh, kw, stride, padding)
    Cout = w_mat.shape[1]
    y = matmul_bn(a, w_mat, bias, relu=relu)
    return y.reshape(B, Ho, Wo, Cout)


def conv1x1_bn(x, w, bias, stride=1, relu=True, residual=None, probs=None,
               out_dtype=jnp.bfloat16):
    """1x1 conv = tiled matmul (optional spatial subsample for stride>1)."""
    if stride > 1:
        # TODO(synk): strided subsample is an XLA copy (1/stride^2 of x);
        # could be folded into the matmul row index_map, minor cost.
        x = x[:, ::stride, ::stride, :]
    B, H, W, Cin = x.shape
    Cout = w.shape[1]
    a = x.reshape(B * H * W, Cin)
    res = None if residual is None else residual.reshape(B * H * W, Cout)
    y = matmul_bn(a, w, bias, residual=res, probs=probs, relu=relu,
                  out_dtype=out_dtype)
    return y.reshape(B, H, W, Cout)


def _build_tap_slabs(x, kh, kw, stride, padding, pad_value):
    """Rearrange NHWC input into stride*kw column-tap slabs (for max-pool)."""
    B, H, W, C = x.shape
    s = stride
    Ho = (H + 2 * padding - kh) // s + 1
    Wo = (W + 2 * padding - kw) // s + 1
    Qh = -(-kh // s)
    Hq = Ho + Qh - 1
    Hneed = s * Hq
    Wneed = s * (Wo - 1) + kw
    pe_h = max(Hneed - H - padding, 0)
    pe_w = max(Wneed - W - padding, 0)
    xp = jnp.pad(x, ((0, 0), (padding, pe_h), (padding, pe_w), (0, 0)),
                 constant_values=pad_value)
    xp = xp[:, :Hneed, :Wneed, :]
    slabs = []
    for ry in range(s):
        for dx in range(kw):
            slabs.append(xp[:, ry: ry + s * (Hq - 1) + 1: s,
                            dx: dx + s * (Wo - 1) + 1: s, :])
    slabs = jnp.stack(slabs, axis=1)             # (B, s*kw, Hq, Wo, C)
    return slabs, Ho, Wo, Hq


def maxpool_3x3_s2_p1(x):
    B, H, W, C = x.shape
    slabs, Ho, Wo, Hq = _build_tap_slabs(x, 3, 3, 2, 1, NEG_BIG)
    P = slabs.shape[1]
    slabs = slabs.reshape(B * P, Hq, Wo, C)
    th = _pick_rows(Ho, 9)
    kernel = functools.partial(_maxpool_tap_kernel, kh=3, kw=3, stride=2, th=th)
    return pl.pallas_call(
        kernel,
        out_shape=jax.ShapeDtypeStruct((B, Ho, Wo, C), x.dtype),
        grid=(B, Ho // th),
        in_specs=[pl.BlockSpec((P, Hq, Wo, C), lambda b, i: (b, 0, 0, 0))],
        out_specs=pl.BlockSpec((1, th, Wo, C), lambda b, i: (b, i, 0, 0)),
        compiler_params=pltpu.CompilerParams(
            dimension_semantics=("parallel", "parallel"),
            vmem_limit_bytes=VMEM_LIMIT),
    )(slabs)


def global_avgpool(x):
    B, H, W, C = x.shape
    xr = x.reshape(B, H * W, C)
    return pl.pallas_call(
        _gap_kernel,
        out_shape=jax.ShapeDtypeStruct((B, C), jnp.float32),
        grid=(B,),
        in_specs=[pl.BlockSpec((1, H * W, C), lambda b: (b, 0, 0))],
        out_specs=pl.BlockSpec((1, C), lambda b: (b, 0)),
        compiler_params=pltpu.CompilerParams(
            dimension_semantics=("parallel",),
            vmem_limit_bytes=VMEM_LIMIT),
    )(xr)


def gate_forward(x, p):
    """Fused routing gate: one pallas_call per block (GAP->fc->relu->fc->softmax)."""
    B, H, W, C = x.shape
    gh = p["gw1"].shape[1]
    xr = x.reshape(B, H * W, C)
    return pl.pallas_call(
        _gate_mlp_kernel,
        out_shape=jax.ShapeDtypeStruct((B, 2), jnp.float32),
        grid=(B,),
        in_specs=[
            pl.BlockSpec((1, H * W, C), lambda b: (b, 0, 0)),
            pl.BlockSpec((C, gh), lambda b: (0, 0)),
            pl.BlockSpec((1, gh), lambda b: (0, 0)),
            pl.BlockSpec((gh, 2), lambda b: (0, 0)),
            pl.BlockSpec((1, 2), lambda b: (0, 0)),
        ],
        out_specs=pl.BlockSpec((1, 2), lambda b: (b, 0)),
        compiler_params=pltpu.CompilerParams(
            dimension_semantics=("parallel",),
            vmem_limit_bytes=VMEM_LIMIT),
    )(xr, p["gw1"], p["gb1"], p["gw2"], p["gb2"])


# ----------------------------------------------------------------------------
# Parameters (deterministic, kaiming-normal like _weights_init; BN folded)
# ----------------------------------------------------------------------------
def kaiming(key, shape, fan_in):
    return jax.random.normal(key, shape, jnp.float32) * math.sqrt(2.0 / fan_in)


def fold_bn(gamma, beta, mean, var):
    scale = gamma / jnp.sqrt(var + BN_EPS)
    bias = beta - mean * scale
    return scale, bias


def bn_identity(c):
    # eval-mode BN with gamma=1, beta=0, running_mean=0, running_var=1
    return fold_bn(jnp.ones((c,), jnp.float32), jnp.zeros((c,), jnp.float32),
                   jnp.zeros((c,), jnp.float32), jnp.ones((c,), jnp.float32))


def make_block_params(key, in_planes, planes, stride, gate_hidden=16):
    exp = 4
    keys = jax.random.split(key, 6)
    p = {"stride": stride}

    s1, b1 = bn_identity(planes)
    w1 = kaiming(keys[0], (in_planes, planes), in_planes)
    p["w1"] = (w1 * s1[None, :]).astype(jnp.bfloat16)
    p["b1"] = b1

    s2, b2 = bn_identity(planes)
    w2 = kaiming(keys[1], (3, 3, planes, planes), planes * 9)
    p["w2"] = ((w2 * s2[None, None, None, :])
               .reshape(9 * planes, planes).astype(jnp.bfloat16))
    p["b2"] = b2

    s3, b3 = bn_identity(exp * planes)
    w3 = kaiming(keys[2], (planes, exp * planes), planes)
    p["w3"] = (w3 * s3[None, :]).astype(jnp.bfloat16)
    p["b3"] = b3

    p["has_shortcut"] = (stride != 1) or (in_planes != exp * planes)
    if p["has_shortcut"]:
        ss, bs = bn_identity(exp * planes)
        ws = kaiming(keys[3], (in_planes, exp * planes), in_planes)
        p["ws"] = (ws * ss[None, :]).astype(jnp.bfloat16)
        p["bs"] = bs

    # small routing-gate MLP: GAP(x) -> fc -> relu -> fc -> softmax(2)
    p["gw1"] = kaiming(keys[4], (in_planes, gate_hidden), in_planes)
    p["gb1"] = jnp.zeros((1, gate_hidden), jnp.float32)
    p["gw2"] = kaiming(keys[5], (gate_hidden, 2), gate_hidden)
    p["gb2"] = jnp.zeros((1, 2), jnp.float32)
    return p


def make_model_params(key, num_blocks=(1, 1, 1, 1), num_classes=10):
    keys = jax.random.split(key, 4)
    sc, bc = bn_identity(64)
    w_stem = kaiming(keys[0], (7, 7, 3, 64), 3 * 49)
    params = {
        "conv1_w": ((w_stem * sc[None, None, None, :])
                    .reshape(49 * 3, 64).astype(jnp.bfloat16)),
        "conv1_b": bc,
    }
    blocks = []
    in_planes = 64
    bkeys = jax.random.split(keys[1], int(sum(num_blocks)))
    bi = 0
    for planes, nb, stride0 in zip((64, 128, 256, 512), num_blocks, (1, 2, 2, 2)):
        strides = [stride0] + [1] * (nb - 1)
        for s in strides:
            blocks.append(make_block_params(bkeys[bi], in_planes, planes, s))
            in_planes = planes * 4
            bi += 1
    params["blocks"] = blocks
    params["fc_w"] = kaiming(keys[2], (512 * 4, num_classes), 512 * 4)
    params["fc_b"] = jnp.zeros((num_classes,), jnp.float32)
    return params


# ----------------------------------------------------------------------------
# Forward pass
# ----------------------------------------------------------------------------
def codinet_block_forward(x, p):
    # TODO(synk): the dynamic-routing `block`/`gate` classes are not given in
    # the reference; this implements standard CoDiNet soft routing
    # out = p_exec * Bottleneck(x) + p_skip * shortcut(x), prob shape [B,2,1,1].
    B = x.shape[0]
    stride = p["stride"]
    prob = gate_forward(x, p)                                    # [B, 2] f32

    out = conv1x1_bn(x, p["w1"], p["b1"], stride=1, relu=True)
    out = conv_kxk_bn(out, p["w2"], p["b2"], kh=3, kw=3, stride=stride,
                      padding=1, relu=True)
    if p["has_shortcut"]:
        short = conv1x1_bn(x, p["ws"], p["bs"], stride=stride, relu=False)
    else:
        short = x

    # Per-row probability columns so the routing blend fuses into the conv3
    # matmul epilogue (deletes the separate memory-bound blend pass).
    Ho, Wo = short.shape[1], short.shape[2]
    hw = Ho * Wo
    pe_rows = jnp.repeat(prob[:, 1], hw).reshape(B * hw, 1)
    ps_rows = jnp.repeat(prob[:, 0], hw).reshape(B * hw, 1)

    # conv3 + bn3 + residual-add + ReLU + soft-routing blend in one kernel.
    combined = conv1x1_bn(out, p["w3"], p["b3"], stride=1, relu=True,
                          residual=short, probs=(pe_rows, ps_rows))
    return combined, prob.reshape(B, 2, 1, 1)


def codinet_forward(x_nchw, params):
    x = jnp.transpose(x_nchw, (0, 2, 3, 1)).astype(jnp.bfloat16)  # NCHW -> NHWC
    # 7x7/s2 stem as im2col (K=147) through the tiled matmul path.
    out = conv_kxk_bn(x, params["conv1_w"], params["conv1_b"],
                      kh=7, kw=7, stride=2, padding=3, relu=True)
    out = maxpool_3x3_s2_p1(out)
    probs = []
    for p in params["blocks"]:
        out, prob = codinet_block_forward(out, p)
        probs.append(prob)
    pooled = global_avgpool(out)                                  # [B, 2048] f32
    logits = matmul_bn(pooled, params["fc_w"], params["fc_b"],
                       relu=False, out_dtype=jnp.float32)
    # stack(dim=0).permute(1,0,2,3,4)  ->  [B, n_blocks, 2, 1, 1]
    gprob = jnp.transpose(jnp.stack(probs, axis=0), (1, 0, 2, 3, 4))
    return logits, gprob


# ----------------------------------------------------------------------------
if __name__ == "__main__":
    key = jax.random.PRNGKey(0)
    pkey, xkey = jax.random.split(key)
    num_blocks = (1, 1, 1, 1)          # small but structurally faithful config
    params = make_model_params(pkey, num_blocks=num_blocks, num_classes=10)
    x = jax.random.normal(xkey, (2, 3, 32, 32), jnp.float32)      # NCHW input
    logits, gprob = codinet_forward(x, params)
    jax.block_until_ready((logits, gprob))
    assert logits.shape == (2, 10), logits.shape
    assert gprob.shape == (2, sum(num_blocks), 2, 1, 1), gprob.shape
    print("KERNEL_OK")
</pallas_src>

<mosaic_0001>
module attributes {stable_mosaic.version = 11 : i64} {
  func.func @_mm_bn_kernel(%arg0: i32, %arg1: i32, %arg2: i32, %arg3: memref<512x147xbf16, #tpu.memory_space<vmem>>, %arg4: memref<147x64xbf16, #tpu.memory_space<vmem>>, %arg5: memref<1x64xf32, #tpu.memory_space<vmem>>, %arg6: memref<512x64xbf16, #tpu.memory_space<vmem>>, %arg7: memref<512x64xf32, #tpu.memory_space<vmem>>) attributes {dimension_semantics = [#tpu.dimension_semantics<parallel>, #tpu.dimension_semantics<parallel>, #tpu.dimension_semantics<arbitrary>], iteration_bounds = array<i64: 1, 1, 1>, scalar_prefetch = 0 : i64, scratch_operands = 1 : i64, tpu.core_type = #tpu.core_type<tc>, window_params = [{transform_indices = @transform_0, window_bounds = array<i64: 512, 147>}, {transform_indices = @transform_1, window_bounds = array<i64: 147, 64>}, {transform_indices = @transform_2, window_bounds = array<i64: 1, 64>}, {transform_indices = @transform_3, window_bounds = array<i64: 512, 64>}]} {
    %c0_i32 = arith.constant 0 : i32
    %0 = arith.cmpi eq, %arg2, %c0_i32 : i32
    %1 = arith.extui %0 : i1 to i32
    %c0_i32_0 = arith.constant 0 : i32
    %2 = arith.cmpi ne, %1, %c0_i32_0 : i32
    scf.if %2 {
      %cst_10 = arith.constant 0.000000e+00 : f32
      %12 = vector.broadcast %cst_10 : f32 to vector<512x64xf32>
      %c0_11 = arith.constant 0 : index
      %c0_12 = arith.constant 0 : index
      %13 = vector.load %arg7[%c0_11, %c0_12] : memref<512x64xf32, #tpu.memory_space<vmem>>, vector<512x64xf32>
      tpu.vector_store %arg7[%c0_11, %c0_12], %12 {strides = array<i32>} : memref<512x64xf32, #tpu.memory_space<vmem>>, vector<512x64xf32>,
    } else {
    }
    %c0 = arith.constant 0 : index
    %c0_1 = arith.constant 0 : index
    %3 = vector.load %arg7[%c0, %c0_1] : memref<512x64xf32, #tpu.memory_space<vmem>>, vector<512x64xf32>
    %c0_2 = arith.constant 0 : index
    %c0_3 = arith.constant 0 : index
    %4 = vector.load %arg3[%c0_2, %c0_3] : memref<512x147xbf16, #tpu.memory_space<vmem>>, vector<512x147xbf16>
    %c0_4 = arith.constant 0 : index
    %c0_5 = arith.constant 0 : index
    %5 = vector.load %arg4[%c0_4, %c0_5] : memref<147x64xbf16, #tpu.memory_space<vmem>>, vector<147x64xbf16>
    %cst = arith.constant dense<0.000000e+00> : vector<512x64xf32>
    %6 = tpu.matmul %4, %5, %cst {dimension_numbers = #tpu.dot_dimension_numbers<[1], [0], [0], [1], [0, 0, 1, 1], [], []>} : vector<512x147xbf16>, vector<147x64xbf16>, vector<512x64xf32> -> vector<512x64xf32>
    %7 = arith.addf %3, %6 : vector<512x64xf32>
    %c0_6 = arith.constant 0 : index
    %c0_7 = arith.constant 0 : index
    %8 = vector.load %arg7[%c0_6, %c0_7] : memref<512x64xf32, #tpu.memory_space<vmem>>, vector<512x64xf32>
    tpu.vector_store %arg7[%c0_6, %c0_7], %7 {strides = array<i32>} : memref<512x64xf32, #tpu.memory_space<vmem>>, vector<512x64xf32>,
    %c0_i32_8 = arith.constant 0 : i32
    %9 = arith.cmpi eq, %arg2, %c0_i32_8 : i32
    %10 = arith.extui %9 : i1 to i32
    %c0_i32_9 = arith.constant 0 : i32
    %11 = arith.cmpi ne, %10, %c0_i32_9 : i32
    scf.if %11 {
      %c0_10 = arith.constant 0 : index
      %c0_11 = arith.constant 0 : index
      %12 = vector.load %arg7[%c0_10, %c0_11] : memref<512x64xf32, #tpu.memory_space<vmem>>, vector<512x64xf32>
      %c0_12 = arith.constant 0 : index
      %c0_13 = arith.constant 0 : index
      %13 = vector.load %arg5[%c0_12, %c0_13] : memref<1x64xf32, #tpu.memory_space<vmem>>, vector<1x64xf32>
      %14 = vector.broadcast %13 : vector<1x64xf32> to vector<512x64xf32>
      %15 = arith.addf %12, %14 : vector<512x64xf32>
      %cst_14 = arith.constant 0.000000e+00 : f32
      %16 = vector.broadcast %cst_14 : f32 to vector<512x64xf32>
      %17 = arith.maximumf %15, %16 : vector<512x64xf32>
      %18 = arith.truncf %17 : vector<512x64xf32> to vector<512x64xbf16>
      %c0_15 = arith.constant 0 : index
      %c0_16 = arith.constant 0 : index
      %19 = vector.load %arg6[%c0_15, %c0_16] : memref<512x64xbf16, #tpu.memory_space<vmem>>, vector<512x64xbf16>
      tpu.vector_store %arg6[%c0_15, %c0_16], %18 {strides = array<i32>} : memref<512x64xbf16, #tpu.memory_space<vmem>>, vector<512x64xbf16>,
    } else {
    }
    return
  }
  func.func @transform_0(%arg0: i32, %arg1: i32, %arg2: i32) -> (i32, i32) {
    %c0_i32 = arith.constant 0 : i32
    return %arg0, %arg2 : i32, i32
  }
  func.func @transform_1(%arg0: i32, %arg1: i32, %arg2: i32) -> (i32, i32) {
    %c0_i32 = arith.constant 0 : i32
    return %arg2, %arg1 : i32, i32
  }
  func.func @transform_2(%arg0: i32, %arg1: i32, %arg2: i32) -> (i32, i32) {
    %c0_i32 = arith.constant 0 : i32
    %c0_i32_0 = arith.constant 0 : i32
    return %c0_i32, %arg1 : i32, i32
  }
  func.func @transform_3(%arg0: i32, %arg1: i32, %arg2: i32) -> (i32, i32) {
    %c0_i32 = arith.constant 0 : i32
    return %arg0, %arg1 : i32, i32
  }
}

</mosaic_0001>

<bundles_post_ra>
// kernel: tpu_custom_call.1
= control target key start
LH: loop header
LB: loop body
LE: loop exit
PB: predicated region body
PF: predicated region fallthrough
CT: control target
= control target key end

     0   :  { %v1990_v0 = vmov 0   ;;  %vm576_vm0 = vcmask 154624   ;;  %vm673_vm1 = vcmask 1040384   ;;  %vm674_vm2 = vcmask 1041408   ;;  %s2793_s1 = inlined_call_operand.vmem [shape: bf16[147,64], index: 1, kind: input, shape index: {}]   ;;  %s2794_s0 = inlined_call_operand.vmem [shape: bf16[512,147], index: 0, kind: input, shape index: {}]   ;;  %s2795_s2 = inlined_call_operand.vmem [shape: f32[1,64], index: 2, kind: input, shape index: {}]   ;;  %s2796_s3 = inlined_call_operand.vmem [shape: bf16[512,64], index: 3, kind: output, shape index: {}]  }
   0x1   :  { %680 = vmatprep.subr.bf16.mxu0 %v1990_v0  ;;  %1860 = vmatprep.subr.bf16.mxu1 %v1990_v0  ;;  %v1883_v1 = vld [vmem:[%s2793_s1 + $0x38] sm:$0xff]   ;;  %v1884_v2 = vld [vmem:[%s2793_s1 + $0x30] sm:$0xff]   ;;  %v1885_v3 = vld [vmem:[%s2793_s1 + $0x28] sm:$0xff]   ;;  %v1991_v10 = vmov 65535   ;;  %vm19_vm3 = vcmask 523264   ;;  %v1992_v17 = vmov 0.0  }
   0x2   :  { %681 = vmatpush1.bf16.msra.mxu0 %v1883_v1  ;;  %1870 = vmatpush1.bf16.msra.mxu1 %v1883_v1  ;;  %v1886_v4 = vld [vmem:[%s2793_s1 + $0x20] sm:$0xff]   ;;  %v1887_v7 = vld [vmem:[%s2793_s1 + $0x18] sm:$0xff]   ;;  %v1888_v8 = vld [vmem:[%s2793_s1 + $0x10] sm:$0xff]   ;;  %v675_v11 = vsel %vm673_vm1, 4294967295, %v1991_v10  ;;  %20 = vst.msk [vmem:[#allocation2] sm:$0xff] %vm19_vm3, %v1992_v17  ;;  %vm1556_vm4 = vcmask 519168  }
   0x3   :  { %682 = vmatprep.subr.bf16.mxu0 %v1990_v0  ;;  %1861 = vmatprep.subr.bf16.mxu1 %v1990_v0  ;;  %v1895_v5 = vld [vmem:[%s2794_s0 + $0x4] ss:$8 sps:$4 sm:$0xff]   ;;  %v1891_v13 = vld [vmem:[%s2793_s1 + $0x48] ss:$0 sps:$4 sm:$0x33]   ;;  %v676_v14 = vsel %vm674_vm2, %v675_v11, 0 }
   0x4   :  { %1699 = vmatprep.mubr.msk.bf16.mxu0 %vm576_vm0, %v1895_v5  ;;  %v1898_v6 = vld [vmem:[%s2794_s0 + $0x104] ss:$8 sps:$4 sm:$0xff]   ;;  %v678_v15 = vand.u32 %v1891_v13, %v676_v14  ;;  %21 = vst.msk [vmem:[#allocation2 + $0x8] sm:$0xff] %vm19_vm3, %v1992_v17  ;;  %22 = vst.msk [vmem:[#allocation2 + $0x10] sm:$0xff] %vm19_vm3, %v1992_v17  ;;  %v1893_v18 = vld [vmem:[%s2794_s0] ss:$8 sps:$4 sm:$0xff]  }
   0x5   :  { %1715 = vmatprep.mubr.msk.bf16.mxu1 %vm576_vm0, %v1898_v6  ;;  %v1889_v9 = vld [vmem:[%s2793_s1 + $0x8] sm:$0xff]   ;;  %v1890_v12 = vld [vmem:[%s2793_s1] sm:$0xff]   ;;  %23 = vst.msk [vmem:[#allocation2 + $0x18] sm:$0xff] %vm19_vm3, %v1992_v17  ;;  %24 = vst.msk [vmem:[#allocation2 + $0x20] sm:$0xff] %vm19_vm3, %v1992_v17 }
   0x6   :  { %683 = vmatpush1.bf16.msra.mxu0 %v1884_v2  ;;  %1871 = vmatpush1.bf16.msra.mxu1 %v1884_v2  ;;  %v2051_v16 = vld [vmem:[%s2793_s1 + $0x40] sm:$0xff]   ;;  %25 = vst.msk [vmem:[#allocation2 + $0x28] sm:$0xff] %vm19_vm3, %v1992_v17  ;;  %26 = vst.msk [vmem:[#allocation2 + $0x30] sm:$0xff] %vm19_vm3, %v1992_v17  ;;  %v1899_v20 = vld [vmem:[%s2794_s0 + $0x14] ss:$8 sps:$4 sm:$0xff]  }
   0x7   :  { %684 = vmatprep.subr.bf16.mxu0 %v1990_v0  ;;  %1862 = vmatprep.subr.bf16.mxu1 %v1990_v0  ;;  %27 = vst.msk [vmem:[#allocation2 + $0x38] sm:$0xff] %vm19_vm3, %v1992_v17  ;;  %28 = vst.msk [vmem:[#allocation2 + $0x40] sm:$0xff] %vm19_vm3, %v1992_v17  ;;  %v1896_v19 = vld [vmem:[%s2794_s0 + $0x100] ss:$8 sps:$4 sm:$0xff]   ;;  %v1901_v21 = vld [vmem:[%s2794_s0 + $0x114] ss:$8 sps:$4 sm:$0xff]  }
   0x8   :  { %29 = vst.msk [vmem:[#allocation2 + $0x48] sm:$0xff] %vm19_vm3, %v1992_v17  ;;  %30 = vst.msk [vmem:[#allocation2 + $0x50] sm:$0xff] %vm19_vm3, %v1992_v17  ;;  %v1903_v22 = vld [vmem:[%s2794_s0 + $0x10] ss:$8 sps:$4 sm:$0xff]   ;;  %v1905_v24 = vld [vmem:[%s2794_s0 + $0x24] ss:$8 sps:$4 sm:$0xff]  }
   0x9   :  { %31 = vst.msk [vmem:[#allocation2 + $0x58] sm:$0xff] %vm19_vm3, %v1992_v17  ;;  %32 = vst.msk [vmem:[#allocation2 + $0x60] sm:$0xff] %vm19_vm3, %v1992_v17  ;;  %v1904_v23 = vld [vmem:[%s2794_s0 + $0x110] ss:$8 sps:$4 sm:$0xff]   ;;  %v1907_v25 = vld [vmem:[%s2794_s0 + $0x124] ss:$8 sps:$4 sm:$0xff]  }
   0xa   :  { %685 = vmatpush1.bf16.msra.mxu0 %v1885_v3  ;;  %1872 = vmatpush1.bf16.msra.mxu1 %v1885_v3  ;;  %33 = vst.msk [vmem:[#allocation2 + $0x68] sm:$0xff] %vm19_vm3, %v1992_v17  ;;  %34 = vst.msk [vmem:[#allocation2 + $0x70] sm:$0xff] %vm19_vm3, %v1992_v17  ;;  %v1909_v26 = vld [vmem:[%s2794_s0 + $0x20] ss:$8 sps:$4 sm:$0xff]   ;;  %v1911_v28 = vld [vmem:[%s2794_s0 + $0x34] ss:$8 sps:$4 sm:$0xff]  }
   0xb   :  { %686 = vmatprep.subr.bf16.mxu0 %v1990_v0  ;;  %1863 = vmatprep.subr.bf16.mxu1 %v1990_v0  ;;  %35 = vst.msk [vmem:[#allocation2 + $0x78] sm:$0xff] %vm19_vm3, %v1992_v17  ;;  %36 = vst.msk [vmem:[#allocation2 + $0x80] sm:$0xff] %vm19_vm3, %v1992_v17  ;;  %v1910_v27 = vld [vmem:[%s2794_s0 + $0x120] ss:$8 sps:$4 sm:$0xff]   ;;  %v1913_v29 = vld [vmem:[%s2794_s0 + $0x134] ss:$8 sps:$4 sm:$0xff]  }
   0xc   :  { %37 = vst.msk [vmem:[#allocation2 + $0x88] sm:$0xff] %vm19_vm3, %v1992_v17  ;;  %38 = vst.msk [vmem:[#allocation2 + $0x90] sm:$0xff] %vm19_vm3, %v1992_v17  ;;  %v1915_v30 = vld [vmem:[%s2794_s0 + $0x30] ss:$8 sps:$4 sm:$0xff]   ;;  %v1917_v32 = vld [vmem:[%s2794_s0 + $0x44] ss:$8 sps:$4 sm:$0xff]  }
   0xd   :  { %39 = vst.msk [vmem:[#allocation2 + $0x98] sm:$0xff] %vm19_vm3, %v1992_v17  ;;  %40 = vst.msk [vmem:[#allocation2 + $0xa0] sm:$0xff] %vm19_vm3, %v1992_v17  ;;  %v1916_v31 = vld [vmem:[%s2794_s0 + $0x130] ss:$8 sps:$4 sm:$0xff]   ;;  %v1919_v33 = vld [vmem:[%s2794_s0 + $0x144] ss:$8 sps:$4 sm:$0xff]  }
   0xe   :  { %687 = vmatpush1.bf16.msra.mxu0 %v1886_v4  ;;  %1873 = vmatpush1.bf16.msra.mxu1 %v1886_v4  ;;  %41 = vst.msk [vmem:[#allocation2 + $0xa8] sm:$0xff] %vm19_vm3, %v1992_v17  ;;  %42 = vst.msk [vmem:[#allocation2 + $0xb0] sm:$0xff] %vm19_vm3, %v1992_v17  ;;  %v1921_v34 = vld [vmem:[%s2794_s0 + $0x40] ss:$8 sps:$4 sm:$0xff]   ;;  %v1923_v36 = vld [vmem:[%s2794_s0 + $0x54] ss:$8 sps:$4 sm:$0xff]  }
   0xf   :  { %688 = vmatprep.subr.bf16.mxu0 %v1990_v0  ;;  %1864 = vmatprep.subr.bf16.mxu1 %v1990_v0  ;;  %43 = vst.msk [vmem:[#allocation2 + $0xb8] sm:$0xff] %vm19_vm3, %v1992_v17  ;;  %44 = vst.msk [vmem:[#allocation2 + $0xc0] sm:$0xff] %vm19_vm3, %v1992_v17  ;;  %v1922_v35 = vld [vmem:[%s2794_s0 + $0x140] ss:$8 sps:$4 sm:$0xff]   ;;  %v1925_v37 = vld [vmem:[%s2794_s0 + $0x154] ss:$8 sps:$4 sm:$0xff]  }
  0x10   :  { %45 = vst.msk [vmem:[#allocation2 + $0xc8] sm:$0xff] %vm19_vm3, %v1992_v17  ;;  %46 = vst.msk [vmem:[#allocation2 + $0xd0] sm:$0xff] %vm19_vm3, %v1992_v17  ;;  %v1927_v38 = vld [vmem:[%s2794_s0 + $0x50] ss:$8 sps:$4 sm:$0xff]   ;;  %v1929_v40 = vld [vmem:[%s2794_s0 + $0x64] ss:$8 sps:$4 sm:$0xff]  }
  0x11   :  { %47 = vst.msk [vmem:[#allocation2 + $0xd8] sm:$0xff] %vm19_vm3, %v1992_v17  ;;  %48 = vst.msk [vmem:[#allocation2 + $0xe0] sm:$0xff] %vm19_vm3, %v1992_v17  ;;  %v1928_v39 = vld [vmem:[%s2794_s0 + $0x150] ss:$8 sps:$4 sm:$0xff]   ;;  %v1931_v41 = vld [vmem:[%s2794_s0 + $0x164] ss:$8 sps:$4 sm:$0xff]  }
  0x12   :  { %689 = vmatpush1.bf16.msra.mxu0 %v1887_v7  ;;  %1874 = vmatpush1.bf16.msra.mxu1 %v1887_v7  ;;  %49 = vst.msk [vmem:[#allocation2 + $0xe8] sm:$0xff] %vm19_vm3, %v1992_v17  ;;  %50 = vst.msk [vmem:[#allocation2 + $0xf0] sm:$0xff] %vm19_vm3, %v1992_v17  ;;  %v1933_v42 = vld [vmem:[%s2794_s0 + $0x60] ss:$8 sps:$4 sm:$0xff]   ;;  %v1935_v44 = vld [vmem:[%s2794_s0 + $0x74] ss:$8 sps:$4 sm:$0xff]  }
  0x13   :  { %690 = vmatprep.subr.bf16.mxu0 %v1990_v0  ;;  %1865 = vmatprep.subr.bf16.mxu1 %v1990_v0  ;;  %51 = vst.msk [vmem:[#allocation2 + $0xf8] sm:$0xff] %vm19_vm3, %v1992_v17  ;;  %52 = vst.msk [vmem:[#allocation2 + $0x100] sm:$0xff] %vm19_vm3, %v1992_v17  ;;  %v1934_v43 = vld [vmem:[%s2794_s0 + $0x160] ss:$8 sps:$4 sm:$0xff]   ;;  %v1937_v45 = vld [vmem:[%s2794_s0 + $0x174] ss:$8 sps:$4 sm:$0xff]  }
  0x14   :  { %53 = vst.msk [vmem:[#allocation2 + $0x108] sm:$0xff] %vm19_vm3, %v1992_v17  ;;  %54 = vst.msk [vmem:[#allocation2 + $0x110] sm:$0xff] %vm19_vm3, %v1992_v17  ;;  %v1939_v46 = vld [vmem:[%s2794_s0 + $0x70] ss:$8 sps:$4 sm:$0xff]   ;;  %v1941_v48 = vld [vmem:[%s2794_s0 + $0x84] ss:$8 sps:$4 sm:$0xff]  }
  0x15   :  { %55 = vst.msk [vmem:[#allocation2 + $0x118] sm:$0xff] %vm19_vm3, %v1992_v17  ;;  %56 = vst.msk [vmem:[#allocation2 + $0x120] sm:$0xff] %vm19_vm3, %v1992_v17  ;;  %v1940_v47 = vld [vmem:[%s2794_s0 + $0x170] ss:$8 sps:$4 sm:$0xff]   ;;  %v1943_v49 = vld [vmem:[%s2794_s0 + $0x184] ss:$8 sps:$4 sm:$0xff]  }
  0x16   :  { %691 = vmatpush1.bf16.msra.mxu0 %v1888_v8  ;;  %1875 = vmatpush1.bf16.msra.mxu1 %v1888_v8  ;;  %57 = vst.msk [vmem:[#allocation2 + $0x128] sm:$0xff] %vm19_vm3, %v1992_v17  ;;  %58 = vst.msk [vmem:[#allocation2 + $0x130] sm:$0xff] %vm19_vm3, %v1992_v17  ;;  %v1945_v50 = vld [vmem:[%s2794_s0 + $0x80] ss:$8 sps:$4 sm:$0xff]   ;;  %v1947_v52 = vld [vmem:[%s2794_s0 + $0x94] ss:$8 sps:$4 sm:$0xff]  }
  0x17   :  { %692 = vmatprep.subr.bf16.mxu0 %v1990_v0  ;;  %1866 = vmatprep.subr.bf16.mxu1 %v1990_v0  ;;  %59 = vst.msk [vmem:[#allocation2 + $0x138] sm:$0xff] %vm19_vm3, %v1992_v17  ;;  %60 = vst.msk [vmem:[#allocation2 + $0x140] sm:$0xff] %vm19_vm3, %v1992_v17  ;;  %v1946_v51 = vld [vmem:[%s2794_s0 + $0x180] ss:$8 sps:$4 sm:$0xff]   ;;  %v1949_v53 = vld [vmem:[%s2794_s0 + $0x194] ss:$8 sps:$4 sm:$0xff]  }
  0x18   :  { %61 = vst.msk [vmem:[#allocation2 + $0x148] sm:$0xff] %vm19_vm3, %v1992_v17  ;;  %62 = vst.msk [vmem:[#allocation2 + $0x150] sm:$0xff] %vm19_vm3, %v1992_v17  ;;  %v1951_v54 = vld [vmem:[%s2794_s0 + $0x90] ss:$8 sps:$4 sm:$0xff]   ;;  %v1953_v56 = vld [vmem:[%s2794_s0 + $0xa4] ss:$8 sps:$4 sm:$0xff]  }
  0x19   :  { %63 = vst.msk [vmem:[#allocation2 + $0x158] sm:$0xff] %vm19_vm3, %v1992_v17  ;;  %64 = vst.msk [vmem:[#allocation2 + $0x160] sm:$0xff] %vm19_vm3, %v1992_v17  ;;  %v1952_v55 = vld [vmem:[%s2794_s0 + $0x190] ss:$8 sps:$4 sm:$0xff]   ;;  %v1955_v57 = vld [vmem:[%s2794_s0 + $0x1a4] ss:$8 sps:$4 sm:$0xff]  }
  0x1a   :  { %693 = vmatpush1.bf16.msra.mxu0 %v1889_v9  ;;  %1876 = vmatpush1.bf16.msra.mxu1 %v1889_v9  ;;  %65 = vst.msk [vmem:[#allocation2 + $0x168] sm:$0xff] %vm19_vm3, %v1992_v17  ;;  %66 = vst.msk [vmem:[#allocation2 + $0x170] sm:$0xff] %vm19_vm3, %v1992_v17  ;;  %v1957_v58 = vld [vmem:[%s2794_s0 + $0xa0] ss:$8 sps:$4 sm:$0xff]   ;;  %v1959_v60 = vld [vmem:[%s2794_s0 + $0xb4] ss:$8 sps:$4 sm:$0xff]  }
  0x1b   :  { %694 = vmatprep.subr.bf16.mxu0 %v1990_v0  ;;  %1867 = vmatprep.subr.bf16.mxu1 %v1990_v0  ;;  %67 = vst.msk [vmem:[#allocation2 + $0x178] sm:$0xff] %vm19_vm3, %v1992_v17  ;;  %68 = vst.msk [vmem:[#allocation2 + $0x180] sm:$0xff] %vm19_vm3, %v1992_v17  ;;  %v1958_v59 = vld [vmem:[%s2794_s0 + $0x1a0] ss:$8 sps:$4 sm:$0xff]   ;;  %v1961_v61 = vld [vmem:[%s2794_s0 + $0x1b4] ss:$8 sps:$4 sm:$0xff]  }
  0x1c   :  { %69 = vst.msk [vmem:[#allocation2 + $0x188] sm:$0xff] %vm19_vm3, %v1992_v17  ;;  %70 = vst.msk [vmem:[#allocation2 + $0x190] sm:$0xff] %vm19_vm3, %v1992_v17  ;;  %v1963_v62 = vld [vmem:[%s2794_s0 + $0xb0] ss:$8 sps:$4 sm:$0xff]   ;;  %v1967_v1 = vld [vmem:[%s2794_s0 + $0x1c4] ss:$8 sps:$4 sm:$0xff]  }
  0x1d   :  { %71 = vst.msk [vmem:[#allocation2 + $0x198] sm:$0xff] %vm19_vm3, %v1992_v17  ;;  %72 = vst.msk [vmem:[#allocation2 + $0x1a0] sm:$0xff] %vm19_vm3, %v1992_v17  ;;  %v1964_v63 = vld [vmem:[%s2794_s0 + $0x1b0] ss:$8 sps:$4 sm:$0xff]   ;;  %v1969_v2 = vld [vmem:[%s2794_s0 + $0xc0] ss:$8 sps:$4 sm:$0xff]  }
  0x1e   :  { %695 = vmatpush1.bf16.msra.mxu0 %v1890_v12  ;;  %1877 = vmatpush1.bf16.msra.mxu1 %v1890_v12  ;;  %73 = vst.msk [vmem:[#allocation2 + $0x1a8] sm:$0xff] %vm19_vm3, %v1992_v17  ;;  %74 = vst.msk [vmem:[#allocation2 + $0x1b0] sm:$0xff] %vm19_vm3, %v1992_v17  ;;  %v1970_v3 = vld [vmem:[%s2794_s0 + $0x1c0] ss:$8 sps:$4 sm:$0xff]   ;;  %v1971_v4 = vld [vmem:[%s2794_s0 + $0xd4] ss:$8 sps:$4 sm:$0xff]  }
  0x1f   :  { %708 = vmatprep.subr.bf16.mxu0 %v1990_v0  ;;  %1868 = vmatprep.subr.bf16.mxu1 %v1990_v0  ;;  %75 = vst.msk [vmem:[#allocation2 + $0x1b8] sm:$0xff] %vm19_vm3, %v1992_v17  ;;  %76 = vst.msk [vmem:[#allocation2 + $0x1c0] sm:$0xff] %vm19_vm3, %v1992_v17  ;;  %v1973_v5 = vld [vmem:[%s2794_s0 + $0x1d4] ss:$8 sps:$4 sm:$0xff]   ;;  %v1975_v6 = vld [vmem:[%s2794_s0 + $0xd0] ss:$8 sps:$4 sm:$0xff]  }
  0x20   :  { %77 = vst.msk [vmem:[#allocation2 + $0x1c8] sm:$0xff] %vm19_vm3, %v1992_v17  ;;  %78 = vst.msk [vmem:[#allocation2 + $0x1d0] sm:$0xff] %vm19_vm3, %v1992_v17  ;;  %v1976_v7 = vld [vmem:[%s2794_s0 + $0x1d0] ss:$8 sps:$4 sm:$0xff]   ;;  %v1977_v8 = vld [vmem:[%s2794_s0 + $0xe4] ss:$8 sps:$4 sm:$0xff]  }
  0x21   :  { %79 = vst.msk [vmem:[#allocation2 + $0x1d8] sm:$0xff] %vm19_vm3, %v1992_v17  ;;  %80 = vst.msk [vmem:[#allocation2 + $0x1e0] sm:$0xff] %vm19_vm3, %v1992_v17  ;;  %v1979_v9 = vld [vmem:[%s2794_s0 + $0x1e4] ss:$8 sps:$4 sm:$0xff]   ;;  %v1981_v10 = vld [vmem:[%s2794_s0 + $0xe0] ss:$8 sps:$4 sm:$0xff]  }
  0x22   :  { %709 = vmatpush2.bf16.msra.mxu0 %v678_v15  ;;  %1878 = vmatpush2.bf16.msra.mxu1 %v678_v15  ;;  %81 = vst.msk [vmem:[#allocation2 + $0x1e8] sm:$0xff] %vm19_vm3, %v1992_v17  ;;  %82 = vst.msk [vmem:[#allocation2 + $0x1f0] sm:$0xff] %vm19_vm3, %v1992_v17  ;;  %v1982_v11 = vld [vmem:[%s2794_s0 + $0x1e0] ss:$8 sps:$4 sm:$0xff]   ;;  %v1983_v12 = vld [vmem:[%s2794_s0 + $0xf4] ss:$8 sps:$4 sm:$0xff]  }
  0x23   :  { %710 = vmatprep.subr.bf16.mxu0 %v1990_v0  ;;  %1869 = vmatprep.subr.bf16.mxu1 %v1990_v0  ;;  %83 = vst.msk [vmem:[#allocation2 + $0x1f8] sm:$0xff] %vm19_vm3, %v1992_v17  ;;  %v1965_v0 = vld [vmem:[%s2794_s0 + $0xc4] ss:$8 sps:$4 sm:$0xff]   ;;  %v1985_v13 = vld [vmem:[%s2794_s0 + $0x1f4] ss:$8 sps:$4 sm:$0xff]  }
  0x24   :  { %v1987_v14 = vld [vmem:[%s2794_s0 + $0xf0] ss:$8 sps:$4 sm:$0xff]   ;;  %v116_v17 = vld [vmem:[#allocation2 + $0x100] sm:$0xff] }
  0x25   :  { %v1988_v15 = vld [vmem:[%s2794_s0 + $0x1f0] ss:$8 sps:$4 sm:$0xff]  }
  0x26   :  { %711 = vmatpush2.bf16.msra.mxu0 %v2051_v16  ;;  %1879 = vmatpush2.bf16.msra.mxu1 %v2051_v16  ;;  %v84_v16 = vld [vmem:[#allocation2] sm:$0xff] }
  0x29   :  { %713 = vmatmul.mubr.bf16.vlgmr.msra.gmra.mxu0 %v1893_v18  ;;  %841 = vmatmul.mubr.bf16.vlgmr.msra.gmra.mxu1 %v1896_v19 }
  0x2a   :  { %1700 = vmatprep.mubr.msk.bf16.mxu0 %vm576_vm0, %v1899_v20  ;;  %1716 = vmatprep.mubr.msk.bf16.mxu1 %vm576_vm0, %v1901_v21 }
  0x31   :  { %721 = vmatmul.mubr.bf16.gmra.mxu0 %v1903_v22  ;;  %849 = vmatmul.mubr.bf16.gmra.mxu1 %v1904_v23 }
  0x32   :  { %1701 = vmatprep.mubr.msk.bf16.mxu0 %vm576_vm0, %v1905_v24  ;;  %1717 = vmatprep.mubr.msk.bf16.mxu1 %vm576_vm0, %v1907_v25  ;;  %v85_v24 = vld [vmem:[#allocation2 + $0x8] sm:$0xff] }
  0x33   :  { %v117_v25 = vld [vmem:[#allocation2 + $0x108] sm:$0xff] }
  0x39   :  { %729 = vmatmul.mubr.bf16.gmra.mxu0 %v1909_v26  ;;  %857 = vmatmul.mubr.bf16.gmra.mxu1 %v1910_v27 }
  0x3a   :  { %1702 = vmatprep.mubr.msk.bf16.mxu0 %vm576_vm0, %v1911_v28  ;;  %1718 = vmatprep.mubr.msk.bf16.mxu1 %vm576_vm0, %v1913_v29 }
  0x41   :  { %737 = vmatmul.mubr.bf16.gmra.mxu0 %v1915_v30  ;;  %865 = vmatmul.mubr.bf16.gmra.mxu1 %v1916_v31 }
  0x42   :  { %1703 = vmatprep.mubr.msk.bf16.mxu0 %vm576_vm0, %v1917_v32  ;;  %1719 = vmatprep.mubr.msk.bf16.mxu1 %vm576_vm0, %v1919_v33  ;;  %v86_v32 = vld [vmem:[#allocation2 + $0x10] sm:$0xff] }
  0x43   :  { %v118_v33 = vld [vmem:[#allocation2 + $0x110] sm:$0xff] }
  0x49   :  { %745 = vmatmul.mubr.bf16.gmra.mxu0 %v1921_v34  ;;  %873 = vmatmul.mubr.bf16.gmra.mxu1 %v1922_v35  ;;  %v2406_v34 = vld [vmem:[%s2795_s2] ss:$0 sm:$0xff] }
  0x4a   :  { %1704 = vmatprep.mubr.msk.bf16.mxu0 %vm576_vm0, %v1923_v36  ;;  %1720 = vmatprep.mubr.msk.bf16.mxu1 %vm576_vm0, %v1925_v37 }
  0x51   :  { %753 = vmatmul.mubr.bf16.gmra.mxu0 %v1927_v38  ;;  %881 = vmatmul.mubr.bf16.gmra.mxu1 %v1928_v39  ;;  %v87_v39 = vld [vmem:[#allocation2 + $0x18] sm:$0xff] }
  0x52   :  { %1705 = vmatprep.mubr.msk.bf16.mxu0 %vm576_vm0, %v1929_v40  ;;  %1721 = vmatprep.mubr.msk.bf16.mxu1 %vm576_vm0, %v1931_v41 }
  0x59   :  { %761 = vmatmul.mubr.bf16.gmra.mxu0 %v1933_v42  ;;  %889 = vmatmul.mubr.bf16.gmra.mxu1 %v1934_v43 }
  0x5a   :  { %1706 = vmatprep.mubr.msk.bf16.mxu0 %vm576_vm0, %v1935_v44  ;;  %1722 = vmatprep.mubr.msk.bf16.mxu1 %vm576_vm0, %v1937_v45  ;;  %v119_v44 = vld [vmem:[#allocation2 + $0x118] sm:$0xff] }
  0x61   :  { %769 = vmatmul.mubr.bf16.gmra.mxu0 %v1939_v46  ;;  %897 = vmatmul.mubr.bf16.gmra.mxu1 %v1940_v47 }
  0x62   :  { %1707 = vmatprep.mubr.msk.bf16.mxu0 %vm576_vm0, %v1941_v48  ;;  %1723 = vmatprep.mubr.msk.bf16.mxu1 %vm576_vm0, %v1943_v49 }
  0x69   :  { %777 = vmatmul.mubr.bf16.gmra.mxu0 %v1945_v50  ;;  %905 = vmatmul.mubr.bf16.gmra.mxu1 %v1946_v51 }
  0x6a   :  { %1708 = vmatprep.mubr.msk.bf16.mxu0 %vm576_vm0, %v1947_v52  ;;  %1724 = vmatprep.mubr.msk.bf16.mxu1 %vm576_vm0, %v1949_v53  ;;  %v88_v53 = vld [vmem:[#allocation2 + $0x20] sm:$0xff] }
  0x71   :  { %785 = vmatmul.mubr.bf16.gmra.mxu0 %v1951_v54  ;;  %913 = vmatmul.mubr.bf16.gmra.mxu1 %v1952_v55 }
  0x72   :  { %1709 = vmatprep.mubr.msk.bf16.mxu0 %vm576_vm0, %v1953_v56  ;;  %1725 = vmatprep.mubr.msk.bf16.mxu1 %vm576_vm0, %v1955_v57 }
  0x79   :  { %793 = vmatmul.mubr.bf16.gmra.mxu0 %v1957_v58  ;;  %921 = vmatmul.mubr.bf16.gmra.mxu1 %v1958_v59  ;;  %v120_v58 = vld [vmem:[#allocation2 + $0x120] sm:$0xff] }
  0x7a   :  { %1710 = vmatprep.mubr.msk.bf16.mxu0 %vm576_vm0, %v1959_v60  ;;  %1726 = vmatprep.mubr.msk.bf16.mxu1 %vm576_vm0, %v1961_v61 }
  0x81   :  { %801 = vmatmul.mubr.bf16.gmra.mxu0 %v1963_v62  ;;  %929 = vmatmul.mubr.bf16.gmra.mxu1 %v1964_v63 }
  0x82   :  { %1711 = vmatprep.mubr.msk.bf16.mxu0 %vm576_vm0, %v1965_v0  ;;  %1727 = vmatprep.mubr.msk.bf16.mxu1 %vm576_vm0, %v1967_v1 }
  0x89   :  { %809 = vmatmul.mubr.bf16.gmra.mxu0 %v1969_v2  ;;  %937 = vmatmul.mubr.bf16.gmra.mxu1 %v1970_v3 }
  0x8a   :  { %1712 = vmatprep.mubr.msk.bf16.mxu0 %vm576_vm0, %v1971_v4  ;;  %1728 = vmatprep.mubr.msk.bf16.mxu1 %vm576_vm0, %v1973_v5  ;;  %v89_v5 = vld [vmem:[#allocation2 + $0x28] sm:$0xff] }
  0x91   :  { %817 = vmatmul.mubr.bf16.gmra.mxu0 %v1975_v6  ;;  %945 = vmatmul.mubr.bf16.gmra.mxu1 %v1976_v7 }
  0x92   :  { %1713 = vmatprep.mubr.msk.bf16.mxu0 %vm576_vm0, %v1977_v8  ;;  %1729 = vmatprep.mubr.msk.bf16.mxu1 %vm576_vm0, %v1979_v9 }
  0x99   :  { %825 = vmatmul.mubr.bf16.gmra.mxu0 %v1981_v10  ;;  %953 = vmatmul.mubr.bf16.gmra.mxu1 %v1982_v11  ;;  %v121_v10 = vld [vmem:[#allocation2 + $0x128] sm:$0xff] }
  0x9a   :  { %1714 = vmatprep.mubr.msk.bf16.mxu0 %vm576_vm0, %v1983_v12  ;;  %1730 = vmatprep.mubr.msk.bf16.mxu1 %vm576_vm0, %v1985_v13 }
  0xa1   :  { %833 = vmatmul.mubr.bf16.gmra.mxu0 %v1987_v14  ;;  %961 = vmatmul.mubr.bf16.gmra.mxu1 %v1988_v15 }
  0xe9   :  { %v714_v18 = vpop.f32.mrf.mxu0  ;;  %v842_v19 = vpop.f32.mrf.mxu1 }
  0xea   :  { %v969_v20 = vadd.f32 %v714_v18, %v84_v16  ;;  %v1001_v21 = vadd.f32 %v842_v19, %v116_v17 }
  0xeb   :  { %v716_v22 = vpop.f32.mrf.mxu0  ;;  %v844_v23 = vpop.f32.mrf.mxu1 }
  0xec   :  { %1034 = vst.msk [vmem:[#allocation2] sm:$0xff] %vm19_vm3, %v969_v20  ;;  %1066 = vst.msk [vmem:[#allocation2 + $0x100] sm:$0xff] %vm19_vm3, %v1001_v21  ;;  %v90_v21 = vld [vmem:[#allocation2 + $0x30] sm:$0xff] }
  0xed   :  { %v717_v26 = vpop.f32.mrf.mxu0  ;;  %v845_v27 = vpop.f32.mrf.mxu1 }
  0xee   :  { %v970_v28 = vadd.f32 %v717_v26, %v85_v24  ;;  %v1002_v29 = vadd.f32 %v845_v27, %v117_v25  ;;  %v122_v26 = vld [vmem:[#allocation2 + $0x130] sm:$0xff] }
  0xef   :  { %v719_v30 = vpop.f32.mrf.mxu0  ;;  %v847_v31 = vpop.f32.mrf.mxu1 }
  0xf0   :  { %1035 = vst.msk [vmem:[#allocation2 + $0x8] sm:$0xff] %vm19_vm3, %v970_v28  ;;  %1067 = vst.msk [vmem:[#allocation2 + $0x108] sm:$0xff] %vm19_vm3, %v1002_v29 }
  0xf1   :  { %v722_v35 = vpop.f32.mrf.mxu0  ;;  %v850_v36 = vpop.f32.mrf.mxu1 }
  0xf2   :  { %v971_v37 = vadd.f32 %v722_v35, %v86_v32  ;;  %v1003_v38 = vadd.f32 %v850_v36, %v118_v33 }
  0xf3   :  { %v1101_v40 = vld [vmem:[#allocation2] sm:$0xff]  ;;  %v724_v42 = vpop.f32.mrf.mxu0  ;;  %v852_v43 = vpop.f32.mrf.mxu1 }
  0xf4   :  { %v1133_v41 = vld [vmem:[#allocation2 + $0x100] sm:$0xff]  ;;  %v1172_v45 = vadd.f32 %v2406_v34, %v1101_v40  ;;  %1036 = vst.msk [vmem:[#allocation2 + $0x10] sm:$0xff] %vm19_vm3, %v971_v37  ;;  %1068 = vst.msk [vmem:[#allocation2 + $0x110] sm:$0xff] %vm19_vm3, %v1003_v38  ;;  %v91_v38 = vld [vmem:[#allocation2 + $0x38] sm:$0xff] }
  0xf5   :  { %v1204_v46 = vadd.f32 %v2406_v34, %v1133_v41  ;;  %v725_v47 = vpop.f32.mrf.mxu0  ;;  %v853_v48 = vpop.f32.mrf.mxu1  ;;  %v123_v43 = vld [vmem:[#allocation2 + $0x138] sm:$0xff] }
  0xf6   :  { %v1236_v49 = vmax.f32 %v1172_v45, 0.0  ;;  %v972_v51 = vadd.f32 %v725_v47, %v87_v39  ;;  %v1004_v52 = vadd.f32 %v853_v48, %v119_v44 }
  0xf7   :  { %v1268_v50 = vmax.f32 %v1204_v46, 0.0  ;;  %v1102_v54 = vld [vmem:[#allocation2 + $0x8] sm:$0xff]  ;;  %v727_v56 = vpop.f32.mrf.mxu0  ;;  %v855_v57 = vpop.f32.mrf.mxu1 }
  0xf8   :  { %v1134_v55 = vld [vmem:[#allocation2 + $0x108] sm:$0xff]  ;;  %v1796_v59 = vpack.c.bf16 %v1236_v49, %v1236_v49  ;;  %v1173_v61 = vadd.f32 %v2406_v34, %v1102_v54  ;;  %1037 = vst.msk [vmem:[#allocation2 + $0x18] sm:$0xff] %vm19_vm3, %v972_v51  ;;  %1069 = vst.msk [vmem:[#allocation2 + $0x118] sm:$0xff] %vm19_vm3, %v1004_v52  ;;  %v92_v54 = vld [vmem:[#allocation2 + $0x40] sm:$0xff] }
  0xf9   :  { %v1828_v60 = vpack.c.bf16 %v1268_v50, %v1268_v50  ;;  %v1205_v62 = vadd.f32 %v2406_v34, %v1134_v55  ;;  %v730_v63 = vpop.f32.mrf.mxu0  ;;  %v858_v0 = vpop.f32.mrf.mxu1 }
  0xfa   :  { %1557 = vst.msk [vmem:[%s2796_s3] sm:$0xf] %vm1556_vm4, %v1796_v59  ;;  %v1237_v1 = vmax.f32 %v1173_v61, 0.0  ;;  %v973_v3 = vadd.f32 %v730_v63, %v88_v53  ;;  %v1005_v4 = vadd.f32 %v858_v0, %v120_v58  ;;  %v124_v59 = vld [vmem:[#allocation2 + $0x140] sm:$0xff] }
  0xfb   :  { %1589 = vst.msk [vmem:[%s2796_s3 + $0x80] sm:$0xf] %vm1556_vm4, %v1828_v60  ;;  %v1269_v2 = vmax.f32 %v1205_v62, 0.0  ;;  %v1103_v6 = vld [vmem:[#allocation2 + $0x10] sm:$0xff]  ;;  %v732_v8 = vpop.f32.mrf.mxu0  ;;  %v860_v9 = vpop.f32.mrf.mxu1 }
  0xfc   :  { %v1135_v7 = vld [vmem:[#allocation2 + $0x110] sm:$0xff]  ;;  %v1797_v11 = vpack.c.bf16 %v1237_v1, %v1237_v1  ;;  %v1174_v13 = vadd.f32 %v2406_v34, %v1103_v6  ;;  %1038 = vst.msk [vmem:[#allocation2 + $0x20] sm:$0xff] %vm19_vm3, %v973_v3  ;;  %1070 = vst.msk [vmem:[#allocation2 + $0x120] sm:$0xff] %vm19_vm3, %v1005_v4  ;;  %v93_v6 = vld [vmem:[#allocation2 + $0x48] sm:$0xff] }
  0xfd   :  { %v1829_v12 = vpack.c.bf16 %v1269_v2, %v1269_v2  ;;  %v1206_v14 = vadd.f32 %v2406_v34, %v1135_v7  ;;  %v733_v15 = vpop.f32.mrf.mxu0  ;;  %v861_v16 = vpop.f32.mrf.mxu1 }
  0xfe   :  { %1558 = vst.msk [vmem:[%s2796_s3 + $0x4] sm:$0xf] %vm1556_vm4, %v1797_v11  ;;  %v1238_v17 = vmax.f32 %v1174_v13, 0.0  ;;  %v974_v19 = vadd.f32 %v733_v15, %v89_v5  ;;  %v1006_v20 = vadd.f32 %v861_v16, %v121_v10  ;;  %v125_v11 = vld [vmem:[#allocation2 + $0x148] sm:$0xff] }
  0xff   :  { %1590 = vst.msk [vmem:[%s2796_s3 + $0x84] sm:$0xf] %vm1556_vm4, %v1829_v12  ;;  %v1270_v18 = vmax.f32 %v1206_v14, 0.0  ;;  %v1104_v22 = vld [vmem:[#allocation2 + $0x18] sm:$0xff]  ;;  %v735_v24 = vpop.f32.mrf.mxu0  ;;  %v863_v25 = vpop.f32.mrf.mxu1 }
 0x100   :  { %v1136_v23 = vld [vmem:[#allocation2 + $0x118] sm:$0xff]  ;;  %v1798_v27 = vpack.c.bf16 %v1238_v17, %v1238_v17  ;;  %v1175_v29 = vadd.f32 %v2406_v34, %v1104_v22  ;;  %1039 = vst.msk [vmem:[#allocation2 + $0x28] sm:$0xff] %vm19_vm3, %v974_v19  ;;  %1071 = vst.msk [vmem:[#allocation2 + $0x128] sm:$0xff] %vm19_vm3, %v1006_v20  ;;  %v94_v22 = vld [vmem:[#allocation2 + $0x50] sm:$0xff] }
 0x101   :  { %v1830_v28 = vpack.c.bf16 %v1270_v18, %v1270_v18  ;;  %v1207_v30 = vadd.f32 %v2406_v34, %v1136_v23  ;;  %v738_v31 = vpop.f32.mrf.mxu0  ;;  %v866_v32 = vpop.f32.mrf.mxu1 }
 0x102   :  { %1559 = vst.msk [vmem:[%s2796_s3 + $0x8] sm:$0xf] %vm1556_vm4, %v1798_v27  ;;  %v1239_v33 = vmax.f32 %v1175_v29, 0.0  ;;  %v975_v36 = vadd.f32 %v738_v31, %v90_v21  ;;  %v1007_v37 = vadd.f32 %v866_v32, %v122_v26  ;;  %v126_v27 = vld [vmem:[#allocation2 + $0x150] sm:$0xff] }
 0x103   :  { %1591 = vst.msk [vmem:[%s2796_s3 + $0x88] sm:$0xf] %vm1556_vm4, %v1830_v28  ;;  %v1271_v35 = vmax.f32 %v1207_v30, 0.0  ;;  %v1105_v39 = vld [vmem:[#allocation2 + $0x20] sm:$0xff]  ;;  %v740_v41 = vpop.f32.mrf.mxu0  ;;  %v868_v42 = vpop.f32.mrf.mxu1 }
 0x104   :  { %v1137_v40 = vld [vmem:[#allocation2 + $0x120] sm:$0xff]  ;;  %v1799_v44 = vpack.c.bf16 %v1239_v33, %v1239_v33  ;;  %v1176_v46 = vadd.f32 %v2406_v34, %v1105_v39  ;;  %1040 = vst.msk [vmem:[#allocation2 + $0x30] sm:$0xff] %vm19_vm3, %v975_v36  ;;  %1072 = vst.msk [vmem:[#allocation2 + $0x130] sm:$0xff] %vm19_vm3, %v1007_v37  ;;  %v95_v39 = vld [vmem:[#allocation2 + $0x58] sm:$0xff] }
 0x105   :  { %v1831_v45 = vpack.c.bf16 %v1271_v35, %v1271_v35  ;;  %v1208_v47 = vadd.f32 %v2406_v34, %v1137_v40  ;;  %v741_v48 = vpop.f32.mrf.mxu0  ;;  %v869_v49 = vpop.f32.mrf.mxu1 }
 0x106   :  { %1560 = vst.msk [vmem:[%s2796_s3 + $0xc] sm:$0xf] %vm1556_vm4, %v1799_v44  ;;  %v1240_v50 = vmax.f32 %v1176_v46, 0.0  ;;  %v976_v52 = vadd.f32 %v741_v48, %v91_v38  ;;  %v1008_v53 = vadd.f32 %v869_v49, %v123_v43  ;;  %v127_v44 = vld [vmem:[#allocation2 + $0x158] sm:$0xff] }
 0x107   :  { %1592 = vst.msk [vmem:[%s2796_s3 + $0x8c] sm:$0xf] %vm1556_vm4, %v1831_v45  ;;  %v1272_v51 = vmax.f32 %v1208_v47, 0.0  ;;  %v1106_v55 = vld [vmem:[#allocation2 + $0x28] sm:$0xff]  ;;  %v743_v57 = vpop.f32.mrf.mxu0  ;;  %v871_v58 = vpop.f32.mrf.mxu1 }
 0x108   :  { %v1138_v56 = vld [vmem:[#allocation2 + $0x128] sm:$0xff]  ;;  %v1800_v60 = vpack.c.bf16 %v1240_v50, %v1240_v50  ;;  %v1177_v62 = vadd.f32 %v2406_v34, %v1106_v55  ;;  %1041 = vst.msk [vmem:[#allocation2 + $0x38] sm:$0xff] %vm19_vm3, %v976_v52  ;;  %1073 = vst.msk [vmem:[#allocation2 + $0x138] sm:$0xff] %vm19_vm3, %v1008_v53  ;;  %v96_v55 = vld [vmem:[#allocation2 + $0x60] sm:$0xff] }
 0x109   :  { %v1832_v61 = vpack.c.bf16 %v1272_v51, %v1272_v51  ;;  %v1209_v63 = vadd.f32 %v2406_v34, %v1138_v56  ;;  %v746_v0 = vpop.f32.mrf.mxu0  ;;  %v874_v1 = vpop.f32.mrf.mxu1 }
 0x10a   :  { %1561 = vst.msk [vmem:[%s2796_s3 + $0x10] sm:$0xf] %vm1556_vm4, %v1800_v60  ;;  %v1241_v2 = vmax.f32 %v1177_v62, 0.0  ;;  %v977_v4 = vadd.f32 %v746_v0, %v92_v54  ;;  %v1009_v5 = vadd.f32 %v874_v1, %v124_v59  ;;  %v128_v60 = vld [vmem:[#allocation2 + $0x160] sm:$0xff] }
 0x10b   :  { %1593 = vst.msk [vmem:[%s2796_s3 + $0x90] sm:$0xf] %vm1556_vm4, %v1832_v61  ;;  %v1273_v3 = vmax.f32 %v1209_v63, 0.0  ;;  %v1107_v7 = vld [vmem:[#allocation2 + $0x30] sm:$0xff]  ;;  %v748_v9 = vpop.f32.mrf.mxu0  ;;  %v876_v10 = vpop.f32.mrf.mxu1 }
 0x10c   :  { %v1139_v8 = vld [vmem:[#allocation2 + $0x130] sm:$0xff]  ;;  %v1801_v12 = vpack.c.bf16 %v1241_v2, %v1241_v2  ;;  %v1178_v14 = vadd.f32 %v2406_v34, %v1107_v7  ;;  %1042 = vst.msk [vmem:[#allocation2 + $0x40] sm:$0xff] %vm19_vm3, %v977_v4  ;;  %1074 = vst.msk [vmem:[#allocation2 + $0x140] sm:$0xff] %vm19_vm3, %v1009_v5  ;;  %v97_v7 = vld [vmem:[#allocation2 + $0x68] sm:$0xff] }
 0x10d   :  { %v1833_v13 = vpack.c.bf16 %v1273_v3, %v1273_v3  ;;  %v1210_v15 = vadd.f32 %v2406_v34, %v1139_v8  ;;  %v749_v16 = vpop.f32.mrf.mxu0  ;;  %v877_v17 = vpop.f32.mrf.mxu1 }
 0x10e   :  { %1562 = vst.msk [vmem:[%s2796_s3 + $0x14] sm:$0xf] %vm1556_vm4, %v1801_v12  ;;  %v1242_v18 = vmax.f32 %v1178_v14, 0.0  ;;  %v978_v20 = vadd.f32 %v749_v16, %v93_v6  ;;  %v1010_v21 = vadd.f32 %v877_v17, %v125_v11  ;;  %v129_v12 = vld [vmem:[#allocation2 + $0x168] sm:$0xff] }
 0x10f   :  { %1594 = vst.msk [vmem:[%s2796_s3 + $0x94] sm:$0xf] %vm1556_vm4, %v1833_v13  ;;  %v1274_v19 = vmax.f32 %v1210_v15, 0.0  ;;  %v1108_v23 = vld [vmem:[#allocation2 + $0x38] sm:$0xff]  ;;  %v751_v25 = vpop.f32.mrf.mxu0  ;;  %v879_v26 = vpop.f32.mrf.mxu1 }
 0x110   :  { %v1140_v24 = vld [vmem:[#allocation2 + $0x138] sm:$0xff]  ;;  %v1802_v28 = vpack.c.bf16 %v1242_v18, %v1242_v18  ;;  %v1179_v30 = vadd.f32 %v2406_v34, %v1108_v23  ;;  %1043 = vst.msk [vmem:[#allocation2 + $0x48] sm:$0xff] %vm19_vm3, %v978_v20  ;;  %1075 = vst.msk [vmem:[#allocation2 + $0x148] sm:$0xff] %vm19_vm3, %v1010_v21  ;;  %v98_v23 = vld [vmem:[#allocation2 + $0x70] sm:$0xff] }
 0x111   :  { %v1834_v29 = vpack.c.bf16 %v1274_v19, %v1274_v19  ;;  %v1211_v31 = vadd.f32 %v2406_v34, %v1140_v24  ;;  %v754_v32 = vpop.f32.mrf.mxu0  ;;  %v882_v33 = vpop.f32.mrf.mxu1 }
 0x112   :  { %1563 = vst.msk [vmem:[%s2796_s3 + $0x18] sm:$0xf] %vm1556_vm4, %v1802_v28  ;;  %v1243_v35 = vmax.f32 %v1179_v30, 0.0  ;;  %v979_v37 = vadd.f32 %v754_v32, %v94_v22  ;;  %v1011_v38 = vadd.f32 %v882_v33, %v126_v27  ;;  %v130_v28 = vld [vmem:[#allocation2 + $0x170] sm:$0xff] }
 0x113   :  { %1595 = vst.msk [vmem:[%s2796_s3 + $0x98] sm:$0xf] %vm1556_vm4, %v1834_v29  ;;  %v1275_v36 = vmax.f32 %v1211_v31, 0.0  ;;  %v1109_v40 = vld [vmem:[#allocation2 + $0x40] sm:$0xff]  ;;  %v756_v42 = vpop.f32.mrf.mxu0  ;;  %v884_v43 = vpop.f32.mrf.mxu1 }
 0x114   :  { %v1141_v41 = vld [vmem:[#allocation2 + $0x140] sm:$0xff]  ;;  %v1803_v45 = vpack.c.bf16 %v1243_v35, %v1243_v35  ;;  %v1180_v47 = vadd.f32 %v2406_v34, %v1109_v40  ;;  %1044 = vst.msk [vmem:[#allocation2 + $0x50] sm:$0xff] %vm19_vm3, %v979_v37  ;;  %1076 = vst.msk [vmem:[#allocation2 + $0x150] sm:$0xff] %vm19_vm3, %v1011_v38  ;;  %v99_v40 = vld [vmem:[#allocation2 + $0x78] sm:$0xff] }
 0x115   :  { %v1835_v46 = vpack.c.bf16 %v1275_v36, %v1275_v36  ;;  %v1212_v48 = vadd.f32 %v2406_v34, %v1141_v41  ;;  %v757_v49 = vpop.f32.mrf.mxu0  ;;  %v885_v50 = vpop.f32.mrf.mxu1 }
 0x116   :  { %1564 = vst.msk [vmem:[%s2796_s3 + $0x1c] sm:$0xf] %vm1556_vm4, %v1803_v45  ;;  %v1244_v51 = vmax.f32 %v1180_v47, 0.0  ;;  %v980_v53 = vadd.f32 %v757_v49, %v95_v39  ;;  %v1012_v54 = vadd.f32 %v885_v50, %v127_v44  ;;  %v131_v45 = vld [vmem:[#allocation2 + $0x178] sm:$0xff] }
 0x117   :  { %1596 = vst.msk [vmem:[%s2796_s3 + $0x9c] sm:$0xf] %vm1556_vm4, %v1835_v46  ;;  %v1276_v52 = vmax.f32 %v1212_v48, 0.0  ;;  %v1110_v56 = vld [vmem:[#allocation2 + $0x48] sm:$0xff]  ;;  %v759_v58 = vpop.f32.mrf.mxu0  ;;  %v887_v59 = vpop.f32.mrf.mxu1 }
 0x118   :  { %v1142_v57 = vld [vmem:[#allocation2 + $0x148] sm:$0xff]  ;;  %v1804_v61 = vpack.c.bf16 %v1244_v51, %v1244_v51  ;;  %v1181_v63 = vadd.f32 %v2406_v34, %v1110_v56  ;;  %1045 = vst.msk [vmem:[#allocation2 + $0x58] sm:$0xff] %vm19_vm3, %v980_v53  ;;  %1077 = vst.msk [vmem:[#allocation2 + $0x158] sm:$0xff] %vm19_vm3, %v1012_v54  ;;  %v100_v56 = vld [vmem:[#allocation2 + $0x80] sm:$0xff] }
 0x119   :  { %v1836_v62 = vpack.c.bf16 %v1276_v52, %v1276_v52  ;;  %v1213_v0 = vadd.f32 %v2406_v34, %v1142_v57  ;;  %v762_v1 = vpop.f32.mrf.mxu0  ;;  %v890_v2 = vpop.f32.mrf.mxu1 }
 0x11a   :  { %1565 = vst.msk [vmem:[%s2796_s3 + $0x20] sm:$0xf] %vm1556_vm4, %v1804_v61  ;;  %v1245_v3 = vmax.f32 %v1181_v63, 0.0  ;;  %v981_v5 = vadd.f32 %v762_v1, %v96_v55  ;;  %v1013_v6 = vadd.f32 %v890_v2, %v128_v60  ;;  %v132_v61 = vld [vmem:[#allocation2 + $0x180] sm:$0xff] }
 0x11b   :  { %1597 = vst.msk [vmem:[%s2796_s3 + $0xa0] sm:$0xf] %vm1556_vm4, %v1836_v62  ;;  %v1277_v4 = vmax.f32 %v1213_v0, 0.0  ;;  %v1111_v8 = vld [vmem:[#allocation2 + $0x50] sm:$0xff]  ;;  %v764_v10 = vpop.f32.mrf.mxu0  ;;  %v892_v11 = vpop.f32.mrf.mxu1 }
 0x11c   :  { %v1143_v9 = vld [vmem:[#allocation2 + $0x150] sm:$0xff]  ;;  %v1805_v13 = vpack.c.bf16 %v1245_v3, %v1245_v3  ;;  %v1182_v15 = vadd.f32 %v2406_v34, %v1111_v8  ;;  %1046 = vst.msk [vmem:[#allocation2 + $0x60] sm:$0xff] %vm19_vm3, %v981_v5  ;;  %1078 = vst.msk [vmem:[#allocation2 + $0x160] sm:$0xff] %vm19_vm3, %v1013_v6  ;;  %v101_v8 = vld [vmem:[#allocation2 + $0x88] sm:$0xff] }
 0x11d   :  { %v1837_v14 = vpack.c.bf16 %v1277_v4, %v1277_v4  ;;  %v1214_v16 = vadd.f32 %v2406_v34, %v1143_v9  ;;  %v765_v17 = vpop.f32.mrf.mxu0  ;;  %v893_v18 = vpop.f32.mrf.mxu1 }
 0x11e   :  { %1566 = vst.msk [vmem:[%s2796_s3 + $0x24] sm:$0xf] %vm1556_vm4, %v1805_v13  ;;  %v1246_v19 = vmax.f32 %v1182_v15, 0.0  ;;  %v982_v21 = vadd.f32 %v765_v17, %v97_v7  ;;  %v1014_v22 = vadd.f32 %v893_v18, %v129_v12  ;;  %v133_v13 = vld [vmem:[#allocation2 + $0x188] sm:$0xff] }
 0x11f   :  { %1598 = vst.msk [vmem:[%s2796_s3 + $0xa4] sm:$0xf] %vm1556_vm4, %v1837_v14  ;;  %v1278_v20 = vmax.f32 %v1214_v16, 0.0  ;;  %v1112_v24 = vld [vmem:[#allocation2 + $0x58] sm:$0xff]  ;;  %v767_v26 = vpop.f32.mrf.mxu0  ;;  %v895_v27 = vpop.f32.mrf.mxu1 }
 0x120   :  { %v1144_v25 = vld [vmem:[#allocation2 + $0x158] sm:$0xff]  ;;  %v1806_v29 = vpack.c.bf16 %v1246_v19, %v1246_v19  ;;  %v1183_v31 = vadd.f32 %v2406_v34, %v1112_v24  ;;  %1047 = vst.msk [vmem:[#allocation2 + $0x68] sm:$0xff] %vm19_vm3, %v982_v21  ;;  %1079 = vst.msk [vmem:[#allocation2 + $0x168] sm:$0xff] %vm19_vm3, %v1014_v22  ;;  %v102_v24 = vld [vmem:[#allocation2 + $0x90] sm:$0xff] }
 0x121   :  { %v1838_v30 = vpack.c.bf16 %v1278_v20, %v1278_v20  ;;  %v1215_v32 = vadd.f32 %v2406_v34, %v1144_v25  ;;  %v770_v33 = vpop.f32.mrf.mxu0  ;;  %v898_v35 = vpop.f32.mrf.mxu1 }
 0x122   :  { %1567 = vst.msk [vmem:[%s2796_s3 + $0x28] sm:$0xf] %vm1556_vm4, %v1806_v29  ;;  %v1247_v36 = vmax.f32 %v1183_v31, 0.0  ;;  %v983_v38 = vadd.f32 %v770_v33, %v98_v23  ;;  %v1015_v39 = vadd.f32 %v898_v35, %v130_v28  ;;  %v134_v29 = vld [vmem:[#allocation2 + $0x190] sm:$0xff] }
 0x123   :  { %1599 = vst.msk [vmem:[%s2796_s3 + $0xa8] sm:$0xf] %vm1556_vm4, %v1838_v30  ;;  %v1279_v37 = vmax.f32 %v1215_v32, 0.0  ;;  %v1113_v41 = vld [vmem:[#allocation2 + $0x60] sm:$0xff]  ;;  %v772_v43 = vpop.f32.mrf.mxu0  ;;  %v900_v44 = vpop.f32.mrf.mxu1 }
 0x124   :  { %v1145_v42 = vld [vmem:[#allocation2 + $0x160] sm:$0xff]  ;;  %v1807_v46 = vpack.c.bf16 %v1247_v36, %v1247_v36  ;;  %v1184_v48 = vadd.f32 %v2406_v34, %v1113_v41  ;;  %1048 = vst.msk [vmem:[#allocation2 + $0x70] sm:$0xff] %vm19_vm3, %v983_v38  ;;  %1080 = vst.msk [vmem:[#allocation2 + $0x170] sm:$0xff] %vm19_vm3, %v1015_v39  ;;  %v103_v41 = vld [vmem:[#allocation2 + $0x98] sm:$0xff] }
 0x125   :  { %v1839_v47 = vpack.c.bf16 %v1279_v37, %v1279_v37  ;;  %v1216_v49 = vadd.f32 %v2406_v34, %v1145_v42  ;;  %v773_v50 = vpop.f32.mrf.mxu0  ;;  %v901_v51 = vpop.f32.mrf.mxu1 }
 0x126   :  { %1568 = vst.msk [vmem:[%s2796_s3 + $0x2c] sm:$0xf] %vm1556_vm4, %v1807_v46  ;;  %v1248_v52 = vmax.f32 %v1184_v48, 0.0  ;;  %v984_v54 = vadd.f32 %v773_v50, %v99_v40  ;;  %v1016_v55 = vadd.f32 %v901_v51, %v131_v45  ;;  %v135_v46 = vld [vmem:[#allocation2 + $0x198] sm:$0xff] }
 0x127   :  { %1600 = vst.msk [vmem:[%s2796_s3 + $0xac] sm:$0xf] %vm1556_vm4, %v1839_v47  ;;  %v1280_v53 = vmax.f32 %v1216_v49, 0.0  ;;  %v1114_v57 = vld [vmem:[#allocation2 + $0x68] sm:$0xff]  ;;  %v775_v59 = vpop.f32.mrf.mxu0  ;;  %v903_v60 = vpop.f32.mrf.mxu1 }
 0x128   :  { %v1146_v58 = vld [vmem:[#allocation2 + $0x168] sm:$0xff]  ;;  %v1808_v62 = vpack.c.bf16 %v1248_v52, %v1248_v52  ;;  %v1185_v0 = vadd.f32 %v2406_v34, %v1114_v57  ;;  %1049 = vst.msk [vmem:[#allocation2 + $0x78] sm:$0xff] %vm19_vm3, %v984_v54  ;;  %1081 = vst.msk [vmem:[#allocation2 + $0x178] sm:$0xff] %vm19_vm3, %v1016_v55  ;;  %v104_v57 = vld [vmem:[#allocation2 + $0xa0] sm:$0xff] }
 0x129   :  { %v1840_v63 = vpack.c.bf16 %v1280_v53, %v1280_v53  ;;  %v1217_v1 = vadd.f32 %v2406_v34, %v1146_v58  ;;  %v778_v2 = vpop.f32.mrf.mxu0  ;;  %v906_v3 = vpop.f32.mrf.mxu1 }
 0x12a   :  { %1569 = vst.msk [vmem:[%s2796_s3 + $0x30] sm:$0xf] %vm1556_vm4, %v1808_v62  ;;  %v1249_v4 = vmax.f32 %v1185_v0, 0.0  ;;  %v985_v6 = vadd.f32 %v778_v2, %v100_v56  ;;  %v1017_v7 = vadd.f32 %v906_v3, %v132_v61  ;;  %v136_v62 = vld [vmem:[#allocation2 + $0x1a0] sm:$0xff] }
 0x12b   :  { %1601 = vst.msk [vmem:[%s2796_s3 + $0xb0] sm:$0xf] %vm1556_vm4, %v1840_v63  ;;  %v1281_v5 = vmax.f32 %v1217_v1, 0.0  ;;  %v1115_v9 = vld [vmem:[#allocation2 + $0x70] sm:$0xff]  ;;  %v780_v11 = vpop.f32.mrf.mxu0  ;;  %v908_v12 = vpop.f32.mrf.mxu1 }
 0x12c   :  { %v1147_v10 = vld [vmem:[#allocation2 + $0x170] sm:$0xff]  ;;  %v1809_v14 = vpack.c.bf16 %v1249_v4, %v1249_v4  ;;  %v1186_v16 = vadd.f32 %v2406_v34, %v1115_v9  ;;  %1050 = vst.msk [vmem:[#allocation2 + $0x80] sm:$0xff] %vm19_vm3, %v985_v6  ;;  %1082 = vst.msk [vmem:[#allocation2 + $0x180] sm:$0xff] %vm19_vm3, %v1017_v7  ;;  %v105_v9 = vld [vmem:[#allocation2 + $0xa8] sm:$0xff] }
 0x12d   :  { %v1841_v15 = vpack.c.bf16 %v1281_v5, %v1281_v5  ;;  %v1218_v17 = vadd.f32 %v2406_v34, %v1147_v10  ;;  %v781_v18 = vpop.f32.mrf.mxu0  ;;  %v909_v19 = vpop.f32.mrf.mxu1 }
 0x12e   :  { %1570 = vst.msk [vmem:[%s2796_s3 + $0x34] sm:$0xf] %vm1556_vm4, %v1809_v14  ;;  %v1250_v20 = vmax.f32 %v1186_v16, 0.0  ;;  %v986_v22 = vadd.f32 %v781_v18, %v101_v8  ;;  %v1018_v23 = vadd.f32 %v909_v19, %v133_v13  ;;  %v137_v14 = vld [vmem:[#allocation2 + $0x1a8] sm:$0xff] }
 0x12f   :  { %1602 = vst.msk [vmem:[%s2796_s3 + $0xb4] sm:$0xf] %vm1556_vm4, %v1841_v15  ;;  %v1282_v21 = vmax.f32 %v1218_v17, 0.0  ;;  %v1116_v25 = vld [vmem:[#allocation2 + $0x78] sm:$0xff]  ;;  %v783_v27 = vpop.f32.mrf.mxu0  ;;  %v911_v28 = vpop.f32.mrf.mxu1 }
 0x130   :  { %v1148_v26 = vld [vmem:[#allocation2 + $0x178] sm:$0xff]  ;;  %v1810_v30 = vpack.c.bf16 %v1250_v20, %v1250_v20  ;;  %v1187_v32 = vadd.f32 %v2406_v34, %v1116_v25  ;;  %1051 = vst.msk [vmem:[#allocation2 + $0x88] sm:$0xff] %vm19_vm3, %v986_v22  ;;  %1083 = vst.msk [vmem:[#allocation2 + $0x188] sm:$0xff] %vm19_vm3, %v1018_v23  ;;  %v106_v25 = vld [vmem:[#allocation2 + $0xb0] sm:$0xff] }
 0x131   :  { %v1842_v31 = vpack.c.bf16 %v1282_v21, %v1282_v21  ;;  %v1219_v33 = vadd.f32 %v2406_v34, %v1148_v26  ;;  %v786_v35 = vpop.f32.mrf.mxu0  ;;  %v914_v36 = vpop.f32.mrf.mxu1 }
 0x132   :  { %1571 = vst.msk [vmem:[%s2796_s3 + $0x38] sm:$0xf] %vm1556_vm4, %v1810_v30  ;;  %v1251_v37 = vmax.f32 %v1187_v32, 0.0  ;;  %v987_v39 = vadd.f32 %v786_v35, %v102_v24  ;;  %v1019_v40 = vadd.f32 %v914_v36, %v134_v29  ;;  %v138_v30 = vld [vmem:[#allocation2 + $0x1b0] sm:$0xff] }
 0x133   :  { %1603 = vst.msk [vmem:[%s2796_s3 + $0xb8] sm:$0xf] %vm1556_vm4, %v1842_v31  ;;  %v1283_v38 = vmax.f32 %v1219_v33, 0.0  ;;  %v1117_v42 = vld [vmem:[#allocation2 + $0x80] sm:$0xff]  ;;  %v788_v44 = vpop.f32.mrf.mxu0  ;;  %v916_v45 = vpop.f32.mrf.mxu1 }
 0x134   :  { %v1149_v43 = vld [vmem:[#allocation2 + $0x180] sm:$0xff]  ;;  %v1811_v47 = vpack.c.bf16 %v1251_v37, %v1251_v37  ;;  %v1188_v49 = vadd.f32 %v2406_v34, %v1117_v42  ;;  %1052 = vst.msk [vmem:[#allocation2 + $0x90] sm:$0xff] %vm19_vm3, %v987_v39  ;;  %1084 = vst.msk [vmem:[#allocation2 + $0x190] sm:$0xff] %vm19_vm3, %v1019_v40  ;;  %v107_v42 = vld [vmem:[#allocation2 + $0xb8] sm:$0xff] }
 0x135   :  { %v1843_v48 = vpack.c.bf16 %v1283_v38, %v1283_v38  ;;  %v1220_v50 = vadd.f32 %v2406_v34, %v1149_v43  ;;  %v789_v51 = vpop.f32.mrf.mxu0  ;;  %v917_v52 = vpop.f32.mrf.mxu1 }
 0x136   :  { %1572 = vst.msk [vmem:[%s2796_s3 + $0x3c] sm:$0xf] %vm1556_vm4, %v1811_v47  ;;  %v1252_v53 = vmax.f32 %v1188_v49, 0.0  ;;  %v988_v55 = vadd.f32 %v789_v51, %v103_v41  ;;  %v1020_v56 = vadd.f32 %v917_v52, %v135_v46  ;;  %v139_v47 = vld [vmem:[#allocation2 + $0x1b8] sm:$0xff] }
 0x137   :  { %1604 = vst.msk [vmem:[%s2796_s3 + $0xbc] sm:$0xf] %vm1556_vm4, %v1843_v48  ;;  %v1284_v54 = vmax.f32 %v1220_v50, 0.0  ;;  %v1118_v58 = vld [vmem:[#allocation2 + $0x88] sm:$0xff]  ;;  %v791_v60 = vpop.f32.mrf.mxu0  ;;  %v919_v61 = vpop.f32.mrf.mxu1 }
 0x138   :  { %v1150_v59 = vld [vmem:[#allocation2 + $0x188] sm:$0xff]  ;;  %v1812_v63 = vpack.c.bf16 %v1252_v53, %v1252_v53  ;;  %v1189_v1 = vadd.f32 %v2406_v34, %v1118_v58  ;;  %1053 = vst.msk [vmem:[#allocation2 + $0x98] sm:$0xff] %vm19_vm3, %v988_v55  ;;  %1085 = vst.msk [vmem:[#allocation2 + $0x198] sm:$0xff] %vm19_vm3, %v1020_v56  ;;  %v108_v58 = vld [vmem:[#allocation2 + $0xc0] sm:$0xff] }
 0x139   :  { %v1844_v0 = vpack.c.bf16 %v1284_v54, %v1284_v54  ;;  %v1221_v2 = vadd.f32 %v2406_v34, %v1150_v59  ;;  %v794_v3 = vpop.f32.mrf.mxu0  ;;  %v922_v4 = vpop.f32.mrf.mxu1 }
 0x13a   :  { %1573 = vst.msk [vmem:[%s2796_s3 + $0x40] sm:$0xf] %vm1556_vm4, %v1812_v63  ;;  %v1253_v5 = vmax.f32 %v1189_v1, 0.0  ;;  %v989_v7 = vadd.f32 %v794_v3, %v104_v57  ;;  %v1021_v8 = vadd.f32 %v922_v4, %v136_v62  ;;  %v140_v63 = vld [vmem:[#allocation2 + $0x1c0] sm:$0xff] }
 0x13b   :  { %1605 = vst.msk [vmem:[%s2796_s3 + $0xc0] sm:$0xf] %vm1556_vm4, %v1844_v0  ;;  %v1285_v6 = vmax.f32 %v1221_v2, 0.0  ;;  %v1119_v10 = vld [vmem:[#allocation2 + $0x90] sm:$0xff]  ;;  %v796_v12 = vpop.f32.mrf.mxu0  ;;  %v924_v13 = vpop.f32.mrf.mxu1 }
 0x13c   :  { %v1151_v11 = vld [vmem:[#allocation2 + $0x190] sm:$0xff]  ;;  %v1813_v15 = vpack.c.bf16 %v1253_v5, %v1253_v5  ;;  %v1190_v17 = vadd.f32 %v2406_v34, %v1119_v10  ;;  %1054 = vst.msk [vmem:[#allocation2 + $0xa0] sm:$0xff] %vm19_vm3, %v989_v7  ;;  %1086 = vst.msk [vmem:[#allocation2 + $0x1a0] sm:$0xff] %vm19_vm3, %v1021_v8  ;;  %v109_v10 = vld [vmem:[#allocation2 + $0xc8] sm:$0xff] }
 0x13d   :  { %v1845_v16 = vpack.c.bf16 %v1285_v6, %v1285_v6  ;;  %v1222_v18 = vadd.f32 %v2406_v34, %v1151_v11  ;;  %v797_v19 = vpop.f32.mrf.mxu0  ;;  %v925_v20 = vpop.f32.mrf.mxu1 }
 0x13e   :  { %1574 = vst.msk [vmem:[%s2796_s3 + $0x44] sm:$0xf] %vm1556_vm4, %v1813_v15  ;;  %v1254_v21 = vmax.f32 %v1190_v17, 0.0  ;;  %v990_v23 = vadd.f32 %v797_v19, %v105_v9  ;;  %v1022_v24 = vadd.f32 %v925_v20, %v137_v14  ;;  %v141_v15 = vld [vmem:[#allocation2 + $0x1c8] sm:$0xff] }
 0x13f   :  { %1606 = vst.msk [vmem:[%s2796_s3 + $0xc4] sm:$0xf] %vm1556_vm4, %v1845_v16  ;;  %v1286_v22 = vmax.f32 %v1222_v18, 0.0  ;;  %v1120_v26 = vld [vmem:[#allocation2 + $0x98] sm:$0xff]  ;;  %v799_v28 = vpop.f32.mrf.mxu0  ;;  %v927_v29 = vpop.f32.mrf.mxu1 }
 0x140   :  { %v1152_v27 = vld [vmem:[#allocation2 + $0x198] sm:$0xff]  ;;  %v1814_v31 = vpack.c.bf16 %v1254_v21, %v1254_v21  ;;  %v1191_v33 = vadd.f32 %v2406_v34, %v1120_v26  ;;  %1055 = vst.msk [vmem:[#allocation2 + $0xa8] sm:$0xff] %vm19_vm3, %v990_v23  ;;  %1087 = vst.msk [vmem:[#allocation2 + $0x1a8] sm:$0xff] %vm19_vm3, %v1022_v24  ;;  %v110_v26 = vld [vmem:[#allocation2 + $0xd0] sm:$0xff] }
 0x141   :  { %v1846_v32 = vpack.c.bf16 %v1286_v22, %v1286_v22  ;;  %v1223_v35 = vadd.f32 %v2406_v34, %v1152_v27  ;;  %v802_v36 = vpop.f32.mrf.mxu0  ;;  %v930_v37 = vpop.f32.mrf.mxu1 }
 0x142   :  { %1575 = vst.msk [vmem:[%s2796_s3 + $0x48] sm:$0xf] %vm1556_vm4, %v1814_v31  ;;  %v1255_v38 = vmax.f32 %v1191_v33, 0.0  ;;  %v991_v40 = vadd.f32 %v802_v36, %v106_v25  ;;  %v1023_v41 = vadd.f32 %v930_v37, %v138_v30  ;;  %v142_v31 = vld [vmem:[#allocation2 + $0x1d0] sm:$0xff] }
 0x143   :  { %1607 = vst.msk [vmem:[%s2796_s3 + $0xc8] sm:$0xf] %vm1556_vm4, %v1846_v32  ;;  %v1287_v39 = vmax.f32 %v1223_v35, 0.0  ;;  %v1121_v43 = vld [vmem:[#allocation2 + $0xa0] sm:$0xff]  ;;  %v804_v45 = vpop.f32.mrf.mxu0  ;;  %v932_v46 = vpop.f32.mrf.mxu1 }
 0x144   :  { %v1153_v44 = vld [vmem:[#allocation2 + $0x1a0] sm:$0xff]  ;;  %v1815_v48 = vpack.c.bf16 %v1255_v38, %v1255_v38  ;;  %v1192_v50 = vadd.f32 %v2406_v34, %v1121_v43  ;;  %1056 = vst.msk [vmem:[#allocation2 + $0xb0] sm:$0xff] %vm19_vm3, %v991_v40  ;;  %1088 = vst.msk [vmem:[#allocation2 + $0x1b0] sm:$0xff] %vm19_vm3, %v1023_v41  ;;  %v111_v43 = vld [vmem:[#allocation2 + $0xd8] sm:$0xff] }
 0x145   :  { %v1847_v49 = vpack.c.bf16 %v1287_v39, %v1287_v39  ;;  %v1224_v51 = vadd.f32 %v2406_v34, %v1153_v44  ;;  %v805_v52 = vpop.f32.mrf.mxu0  ;;  %v933_v53 = vpop.f32.mrf.mxu1 }
 0x146   :  { %1576 = vst.msk [vmem:[%s2796_s3 + $0x4c] sm:$0xf] %vm1556_vm4, %v1815_v48  ;;  %v1256_v54 = vmax.f32 %v1192_v50, 0.0  ;;  %v992_v56 = vadd.f32 %v805_v52, %v107_v42  ;;  %v1024_v57 = vadd.f32 %v933_v53, %v139_v47  ;;  %v143_v48 = vld [vmem:[#allocation2 + $0x1d8] sm:$0xff] }
 0x147   :  { %1608 = vst.msk [vmem:[%s2796_s3 + $0xcc] sm:$0xf] %vm1556_vm4, %v1847_v49  ;;  %v1288_v55 = vmax.f32 %v1224_v51, 0.0  ;;  %v1122_v59 = vld [vmem:[#allocation2 + $0xa8] sm:$0xff]  ;;  %v807_v61 = vpop.f32.mrf.mxu0  ;;  %v935_v62 = vpop.f32.mrf.mxu1 }
 0x148   :  { %v1154_v60 = vld [vmem:[#allocation2 + $0x1a8] sm:$0xff]  ;;  %v1816_v0 = vpack.c.bf16 %v1256_v54, %v1256_v54  ;;  %v1193_v2 = vadd.f32 %v2406_v34, %v1122_v59  ;;  %1057 = vst.msk [vmem:[#allocation2 + $0xb8] sm:$0xff] %vm19_vm3, %v992_v56  ;;  %1089 = vst.msk [vmem:[#allocation2 + $0x1b8] sm:$0xff] %vm19_vm3, %v1024_v57  ;;  %v112_v59 = vld [vmem:[#allocation2 + $0xe0] sm:$0xff] }
 0x149   :  { %v1848_v1 = vpack.c.bf16 %v1288_v55, %v1288_v55  ;;  %v1225_v3 = vadd.f32 %v2406_v34, %v1154_v60  ;;  %v810_v4 = vpop.f32.mrf.mxu0  ;;  %v938_v5 = vpop.f32.mrf.mxu1 }
 0x14a   :  { %1577 = vst.msk [vmem:[%s2796_s3 + $0x50] sm:$0xf] %vm1556_vm4, %v1816_v0  ;;  %v1257_v6 = vmax.f32 %v1193_v2, 0.0  ;;  %v993_v8 = vadd.f32 %v810_v4, %v108_v58  ;;  %v1025_v9 = vadd.f32 %v938_v5, %v140_v63  ;;  %v144_v0 = vld [vmem:[#allocation2 + $0x1e0] sm:$0xff] }
 0x14b   :  { %1609 = vst.msk [vmem:[%s2796_s3 + $0xd0] sm:$0xf] %vm1556_vm4, %v1848_v1  ;;  %v1289_v7 = vmax.f32 %v1225_v3, 0.0  ;;  %v1123_v11 = vld [vmem:[#allocation2 + $0xb0] sm:$0xff]  ;;  %v812_v13 = vpop.f32.mrf.mxu0  ;;  %v940_v14 = vpop.f32.mrf.mxu1  ;;  %v2704_v4 = vld [vmem:[%s2795_s2] ss:$0 sm:$0xff] }
 0x14c   :  { %v1155_v12 = vld [vmem:[#allocation2 + $0x1b0] sm:$0xff]  ;;  %v1817_v16 = vpack.c.bf16 %v1257_v6, %v1257_v6  ;;  %v1194_v18 = vadd.f32 %v2406_v34, %v1123_v11  ;;  %1058 = vst.msk [vmem:[#allocation2 + $0xc0] sm:$0xff] %vm19_vm3, %v993_v8  ;;  %1090 = vst.msk [vmem:[#allocation2 + $0x1c0] sm:$0xff] %vm19_vm3, %v1025_v9  ;;  %v113_v11 = vld [vmem:[#allocation2 + $0xe8] sm:$0xff] }
 0x14d   :  { %v1849_v17 = vpack.c.bf16 %v1289_v7, %v1289_v7  ;;  %v1226_v19 = vadd.f32 %v2406_v34, %v1155_v12  ;;  %v813_v20 = vpop.f32.mrf.mxu0  ;;  %v941_v21 = vpop.f32.mrf.mxu1 }
 0x14e   :  { %1578 = vst.msk [vmem:[%s2796_s3 + $0x54] sm:$0xf] %vm1556_vm4, %v1817_v16  ;;  %v1258_v22 = vmax.f32 %v1194_v18, 0.0  ;;  %v994_v24 = vadd.f32 %v813_v20, %v109_v10  ;;  %v1026_v25 = vadd.f32 %v941_v21, %v141_v15  ;;  %v145_v16 = vld [vmem:[#allocation2 + $0x1e8] sm:$0xff] }
 0x14f   :  { %1610 = vst.msk [vmem:[%s2796_s3 + $0xd4] sm:$0xf] %vm1556_vm4, %v1849_v17  ;;  %v1290_v23 = vmax.f32 %v1226_v19, 0.0  ;;  %v1124_v27 = vld [vmem:[#allocation2 + $0xb8] sm:$0xff]  ;;  %v815_v29 = vpop.f32.mrf.mxu0  ;;  %v943_v30 = vpop.f32.mrf.mxu1 }
 0x150   :  { %v1156_v28 = vld [vmem:[#allocation2 + $0x1b8] sm:$0xff]  ;;  %v1818_v32 = vpack.c.bf16 %v1258_v22, %v1258_v22  ;;  %v1195_v35 = vadd.f32 %v2406_v34, %v1124_v27  ;;  %1059 = vst.msk [vmem:[#allocation2 + $0xc8] sm:$0xff] %vm19_vm3, %v994_v24  ;;  %1091 = vst.msk [vmem:[#allocation2 + $0x1c8] sm:$0xff] %vm19_vm3, %v1026_v25  ;;  %v114_v27 = vld [vmem:[#allocation2 + $0xf0] sm:$0xff] }
 0x151   :  { %v1850_v33 = vpack.c.bf16 %v1290_v23, %v1290_v23  ;;  %v1227_v36 = vadd.f32 %v2406_v34, %v1156_v28  ;;  %v818_v37 = vpop.f32.mrf.mxu0  ;;  %v946_v38 = vpop.f32.mrf.mxu1 }
 0x152   :  { %1579 = vst.msk [vmem:[%s2796_s3 + $0x58] sm:$0xf] %vm1556_vm4, %v1818_v32  ;;  %v1259_v39 = vmax.f32 %v1195_v35, 0.0  ;;  %v995_v41 = vadd.f32 %v818_v37, %v110_v26  ;;  %v1027_v42 = vadd.f32 %v946_v38, %v142_v31  ;;  %v146_v32 = vld [vmem:[#allocation2 + $0x1f0] sm:$0xff] }
 0x153   :  { %1611 = vst.msk [vmem:[%s2796_s3 + $0xd8] sm:$0xf] %vm1556_vm4, %v1850_v33  ;;  %v1291_v40 = vmax.f32 %v1227_v36, 0.0  ;;  %v1125_v44 = vld [vmem:[#allocation2 + $0xc0] sm:$0xff]  ;;  %v820_v46 = vpop.f32.mrf.mxu0  ;;  %v948_v47 = vpop.f32.mrf.mxu1 }
 0x154   :  { %v1157_v45 = vld [vmem:[#allocation2 + $0x1c0] sm:$0xff]  ;;  %v1819_v49 = vpack.c.bf16 %v1259_v39, %v1259_v39  ;;  %v1196_v51 = vadd.f32 %v2406_v34, %v1125_v44  ;;  %1060 = vst.msk [vmem:[#allocation2 + $0xd0] sm:$0xff] %vm19_vm3, %v995_v41  ;;  %1092 = vst.msk [vmem:[#allocation2 + $0x1d0] sm:$0xff] %vm19_vm3, %v1027_v42  ;;  %v115_v44 = vld [vmem:[#allocation2 + $0xf8] sm:$0xff] }
 0x155   :  { %v1851_v50 = vpack.c.bf16 %v1291_v40, %v1291_v40  ;;  %v1228_v52 = vadd.f32 %v2406_v34, %v1157_v45  ;;  %v821_v53 = vpop.f32.mrf.mxu0  ;;  %v949_v54 = vpop.f32.mrf.mxu1 }
 0x156   :  { %1580 = vst.msk [vmem:[%s2796_s3 + $0x5c] sm:$0xf] %vm1556_vm4, %v1819_v49  ;;  %v1260_v55 = vmax.f32 %v1196_v51, 0.0  ;;  %v996_v57 = vadd.f32 %v821_v53, %v111_v43  ;;  %v1028_v58 = vadd.f32 %v949_v54, %v143_v48  ;;  %v147_v49 = vld [vmem:[#allocation2 + $0x1f8] sm:$0xff] }
 0x157   :  { %1612 = vst.msk [vmem:[%s2796_s3 + $0xdc] sm:$0xf] %vm1556_vm4, %v1851_v50  ;;  %v1292_v56 = vmax.f32 %v1228_v52, 0.0  ;;  %v1126_v60 = vld [vmem:[#allocation2 + $0xc8] sm:$0xff]  ;;  %v823_v62 = vpop.f32.mrf.mxu0  ;;  %v951_v63 = vpop.f32.mrf.mxu1 }
 0x158   :  { %v1158_v61 = vld [vmem:[#allocation2 + $0x1c8] sm:$0xff]  ;;  %v1820_v1 = vpack.c.bf16 %v1260_v55, %v1260_v55  ;;  %v1197_v3 = vadd.f32 %v2406_v34, %v1126_v60  ;;  %1061 = vst.msk [vmem:[#allocation2 + $0xd8] sm:$0xff] %vm19_vm3, %v996_v57  ;;  %1093 = vst.msk [vmem:[#allocation2 + $0x1d8] sm:$0xff] %vm19_vm3, %v1028_v58 }
 0x159   :  { %v1852_v2 = vpack.c.bf16 %v1292_v56, %v1292_v56  ;;  %v1229_v5 = vadd.f32 %v2704_v4, %v1158_v61  ;;  %v826_v6 = vpop.f32.mrf.mxu0  ;;  %v954_v7 = vpop.f32.mrf.mxu1 }
 0x15a   :  { %1581 = vst.msk [vmem:[%s2796_s3 + $0x60] sm:$0xf] %vm1556_vm4, %v1820_v1  ;;  %v1261_v34 = vmax.f32 %v1197_v3, 0.0  ;;  %v997_v9 = vadd.f32 %v826_v6, %v112_v59  ;;  %v1029_v10 = vadd.f32 %v954_v7, %v144_v0 }
 0x15b   :  { %1613 = vst.msk [vmem:[%s2796_s3 + $0xe0] sm:$0xf] %vm1556_vm4, %v1852_v2  ;;  %v1293_v8 = vmax.f32 %v1229_v5, 0.0  ;;  %v1127_v12 = vld [vmem:[#allocation2 + $0xd0] sm:$0xff]  ;;  %v828_v14 = vpop.f32.mrf.mxu0  ;;  %v956_v15 = vpop.f32.mrf.mxu1 }
 0x15c   :  { %v1159_v13 = vld [vmem:[#allocation2 + $0x1d0] sm:$0xff]  ;;  %v1821_v17 = vpack.c.bf16 %v1261_v34, %v1261_v34  ;;  %v1198_v19 = vadd.f32 %v2704_v4, %v1127_v12  ;;  %1062 = vst.msk [vmem:[#allocation2 + $0xe0] sm:$0xff] %vm19_vm3, %v997_v9  ;;  %1094 = vst.msk [vmem:[#allocation2 + $0x1e0] sm:$0xff] %vm19_vm3, %v1029_v10 }
 0x15d   :  { %v1853_v18 = vpack.c.bf16 %v1293_v8, %v1293_v8  ;;  %v1230_v20 = vadd.f32 %v2704_v4, %v1159_v13  ;;  %v829_v21 = vpop.f32.mrf.mxu0  ;;  %v957_v22 = vpop.f32.mrf.mxu1 }
 0x15e   :  { %1582 = vst.msk [vmem:[%s2796_s3 + $0x64] sm:$0xf] %vm1556_vm4, %v1821_v17  ;;  %v1262_v23 = vmax.f32 %v1198_v19, 0.0  ;;  %v998_v25 = vadd.f32 %v829_v21, %v113_v11  ;;  %v1030_v26 = vadd.f32 %v957_v22, %v145_v16 }
 0x15f   :  { %1614 = vst.msk [vmem:[%s2796_s3 + $0xe4] sm:$0xf] %vm1556_vm4, %v1853_v18  ;;  %v1294_v24 = vmax.f32 %v1230_v20, 0.0  ;;  %v1128_v28 = vld [vmem:[#allocation2 + $0xd8] sm:$0xff]  ;;  %v831_v30 = vpop.f32.mrf.mxu0  ;;  %v959_v31 = vpop.f32.mrf.mxu1 }
 0x160   :  { %v1160_v29 = vld [vmem:[#allocation2 + $0x1d8] sm:$0xff]  ;;  %v1822_v33 = vpack.c.bf16 %v1262_v23, %v1262_v23  ;;  %v1199_v36 = vadd.f32 %v2704_v4, %v1128_v28  ;;  %1063 = vst.msk [vmem:[#allocation2 + $0xe8] sm:$0xff] %vm19_vm3, %v998_v25  ;;  %1095 = vst.msk [vmem:[#allocation2 + $0x1e8] sm:$0xff] %vm19_vm3, %v1030_v26 }
 0x161   :  { %v1854_v35 = vpack.c.bf16 %v1294_v24, %v1294_v24  ;;  %v1231_v37 = vadd.f32 %v2704_v4, %v1160_v29  ;;  %v834_v38 = vpop.f32.mrf.mxu0  ;;  %v962_v39 = vpop.f32.mrf.mxu1 }
 0x162   :  { %1583 = vst.msk [vmem:[%s2796_s3 + $0x68] sm:$0xf] %vm1556_vm4, %v1822_v33  ;;  %v1263_v40 = vmax.f32 %v1199_v36, 0.0  ;;  %v999_v42 = vadd.f32 %v834_v38, %v114_v27  ;;  %v1031_v43 = vadd.f32 %v962_v39, %v146_v32 }
 0x163   :  { %1615 = vst.msk [vmem:[%s2796_s3 + $0xe8] sm:$0xf] %vm1556_vm4, %v1854_v35  ;;  %v1295_v41 = vmax.f32 %v1231_v37, 0.0  ;;  %v1129_v45 = vld [vmem:[#allocation2 + $0xe0] sm:$0xff]  ;;  %v836_v47 = vpop.f32.mrf.mxu0  ;;  %v964_v48 = vpop.f32.mrf.mxu1 }
 0x164   :  { %v1161_v46 = vld [vmem:[#allocation2 + $0x1e0] sm:$0xff]  ;;  %v1823_v50 = vpack.c.bf16 %v1263_v40, %v1263_v40  ;;  %v1200_v52 = vadd.f32 %v2704_v4, %v1129_v45  ;;  %1064 = vst.msk [vmem:[#allocation2 + $0xf0] sm:$0xff] %vm19_vm3, %v999_v42  ;;  %1096 = vst.msk [vmem:[#allocation2 + $0x1f0] sm:$0xff] %vm19_vm3, %v1031_v43 }
 0x165   :  { %v1855_v51 = vpack.c.bf16 %v1295_v41, %v1295_v41  ;;  %v1232_v53 = vadd.f32 %v2704_v4, %v1161_v46  ;;  %v837_v54 = vpop.f32.mrf.mxu0  ;;  %v965_v55 = vpop.f32.mrf.mxu1 }
 0x166   :  { %1584 = vst.msk [vmem:[%s2796_s3 + $0x6c] sm:$0xf] %vm1556_vm4, %v1823_v50  ;;  %v1264_v56 = vmax.f32 %v1200_v52, 0.0  ;;  %v1000_v58 = vadd.f32 %v837_v54, %v115_v44  ;;  %v1032_v59 = vadd.f32 %v965_v55, %v147_v49 }
 0x167   :  { %1616 = vst.msk [vmem:[%s2796_s3 + $0xec] sm:$0xf] %vm1556_vm4, %v1855_v51  ;;  %v1296_v57 = vmax.f32 %v1232_v53, 0.0  ;;  %v1130_v60 = vld [vmem:[#allocation2 + $0xe8] sm:$0xff]  ;;  %v839_v62 = vpop.f32.mrf.mxu0  ;;  %v967_v63 = vpop.f32.mrf.mxu1 }
 0x168   :  { %v1162_v61 = vld [vmem:[#allocation2 + $0x1e8] sm:$0xff]  ;;  %v1824_v0 = vpack.c.bf16 %v1264_v56, %v1264_v56  ;;  %v1201_v2 = vadd.f32 %v2704_v4, %v1130_v60  ;;  %1065 = vst.msk [vmem:[#allocation2 + $0xf8] sm:$0xff] %vm19_vm3, %v1000_v58  ;;  %1097 = vst.msk [vmem:[#allocation2 + $0x1f8] sm:$0xff] %vm19_vm3, %v1032_v59 }
 0x169   :  { %v1856_v1 = vpack.c.bf16 %v1296_v57, %v1296_v57  ;;  %v1233_v3 = vadd.f32 %v2704_v4, %v1162_v61 }
 0x16a   :  { %1585 = vst.msk [vmem:[%s2796_s3 + $0x70] sm:$0xf] %vm1556_vm4, %v1824_v0  ;;  %v1265_v5 = vmax.f32 %v1201_v2, 0.0 }
 0x16b   :  { %1617 = vst.msk [vmem:[%s2796_s3 + $0xf0] sm:$0xf] %vm1556_vm4, %v1856_v1  ;;  %v1297_v6 = vmax.f32 %v1233_v3, 0.0  ;;  %v1131_v7 = vld [vmem:[#allocation2 + $0xf0] sm:$0xff] }
 0x16c   :  { %v1163_v34 = vld [vmem:[#allocation2 + $0x1f0] sm:$0xff]  ;;  %v1825_v8 = vpack.c.bf16 %v1265_v5, %v1265_v5  ;;  %v1202_v10 = vadd.f32 %v2704_v4, %v1131_v7 }
 0x16d   :  { %v1857_v9 = vpack.c.bf16 %v1297_v6, %v1297_v6  ;;  %v1234_v11 = vadd.f32 %v2704_v4, %v1163_v34 }
 0x16e   :  { %1586 = vst.msk [vmem:[%s2796_s3 + $0x74] sm:$0xf] %vm1556_vm4, %v1825_v8  ;;  %v1266_v12 = vmax.f32 %v1202_v10, 0.0 }
 0x16f   :  { %1618 = vst.msk [vmem:[%s2796_s3 + $0xf4] sm:$0xf] %vm1556_vm4, %v1857_v9  ;;  %v1298_v13 = vmax.f32 %v1234_v11, 0.0  ;;  %v1132_v14 = vld [vmem:[#allocation2 + $0xf8] sm:$0xff] }
 0x170   :  { %v1164_v15 = vld [vmem:[#allocation2 + $0x1f8] sm:$0xff]  ;;  %v1826_v16 = vpack.c.bf16 %v1266_v12, %v1266_v12  ;;  %v1203_v18 = vadd.f32 %v2704_v4, %v1132_v14 }
 0x171   :  { %v1858_v17 = vpack.c.bf16 %v1298_v13, %v1298_v13  ;;  %v1235_v19 = vadd.f32 %v2704_v4, %v1164_v15 }
 0x172   :  { %1587 = vst.msk [vmem:[%s2796_s3 + $0x78] sm:$0xf] %vm1556_vm4, %v1826_v16  ;;  %v1267_v20 = vmax.f32 %v1203_v18, 0.0 }
 0x173   :  { %1619 = vst.msk [vmem:[%s2796_s3 + $0xf8] sm:$0xf] %vm1556_vm4, %v1858_v17  ;;  %v1299_v21 = vmax.f32 %v1235_v19, 0.0 }
 0x174   :  { %v1827_v22 = vpack.c.bf16 %v1267_v20, %v1267_v20 }
 0x175   :  { %v1859_v23 = vpack.c.bf16 %v1299_v21, %v1299_v21 }
 0x176   :  { %1588 = vst.msk [vmem:[%s2796_s3 + $0x7c] sm:$0xf] %vm1556_vm4, %v1827_v22 }
 0x177   :  { %1620 = vst.msk [vmem:[%s2796_s3 + $0xfc] sm:$0xf] %vm1556_vm4, %v1859_v23 }

</bundles_post_ra>
